<compile_context>
chip_gen: v6e
topology: v6e:2x2x1
jax: 0.10.0
libtpu: 0.0.40
codegen_flags: <defaults>
</compile_context>

<pallas_src>
import functools

import jax
import jax.numpy as jnp
from jax import lax
from jax.experimental import pallas as pl
from jax.experimental.pallas import tpu as pltpu

BN_EPS = 1e-5


def _round_up(n, m):
    return ((n + m - 1) // m) * m


# ----------------------------------------------------------------------------
# Fused kernel: conv-as-matmul + ReLU + GAP (accumulated over HW tiles)
#               -> Linear -> BatchNorm1d (batch stats) -> ReLU -> Linear
#               -> optional cross-batch normalize  (x - mean(0)) / std(0) [unbiased]
#
# Grid axis 0 tiles the flattened B*HW patch rows ("arbitrary": GAP accumulator
# lives in VMEM scratch across the axis).  The projection head and all batch
# statistics run once at the last grid step; this is correct because the batch
# dimension B is never tiled — the whole batch is resident in the kernel.
# ----------------------------------------------------------------------------
def _fused_kernel(patch_ref, pool_ref, wc_ref, bc_ref, w1_ref, b1_ref,
                  g_ref, be_ref, w2_ref, b2_ref, out_ref, feat_acc,
                  *, batch, normalize):
    t = pl.program_id(0)

    @pl.when(t == 0)
    def _():
        feat_acc[...] = jnp.zeros_like(feat_acc)

    # Backbone stem on this tile of patch rows.
    # TODO(synk): cast patches/weights to bf16 (keep f32 accumulation) once the
    # problem size is MXU-bound; kept f32 here for reference-level accuracy.
    h0 = jnp.dot(patch_ref[...], wc_ref[...],
                 preferred_element_type=jnp.float32) + bc_ref[...]
    h0 = jnp.maximum(h0, 0.0)                                   # ReLU  [TR, F0P]

    # Global average pool as a pooling matmul (block-diagonal 1/HW matrix):
    # stays on the MXU instead of a cross-sublane XLU reduce.
    feat_acc[...] += jnp.dot(pool_ref[...], h0,
                             preferred_element_type=jnp.float32)  # [B, F0P]

    @pl.when(t == pl.num_programs(0) - 1)
    def _():
        feats = feat_acc[...]                                   # [B, F0P]
        h = jnp.dot(feats, w1_ref[...],
                    preferred_element_type=jnp.float32) + b1_ref[...]
        # BatchNorm1d, training mode: biased batch statistics over full batch.
        mu = jnp.mean(h, axis=0, keepdims=True)
        var = jnp.mean((h - mu) ** 2, axis=0, keepdims=True)
        h = (h - mu) * lax.rsqrt(var + BN_EPS) * g_ref[...] + be_ref[...]
        h = jnp.maximum(h, 0.0)                                 # ReLU
        o = jnp.dot(h, w2_ref[...],
                    preferred_element_type=jnp.float32) + b2_ref[...]
        if normalize:
            # torch .std(0): unbiased (ddof=1); requires batch >= 2.
            mu2 = jnp.mean(o, axis=0, keepdims=True)
            var2 = jnp.sum((o - mu2) ** 2, axis=0, keepdims=True) / (batch - 1)
            o = (o - mu2) * lax.rsqrt(var2)
        out_ref[...] = o


def _pick_tile_rows(rows):
    # Single tile for small problems; otherwise the largest lane/sublane-friendly
    # divisor so the (double-buffered) patch tile stays comfortably inside VMEM.
    if rows <= 2048:
        return rows
    for cand in (2048, 1024, 512, 256, 128):
        if rows % cand == 0:
            return cand
    return rows  # TODO(synk): ragged HW tiling for awkward B*H*W sizes.


def barlow_twins_forward(x, params, normalize=False):
    B, C, H, W = x.shape
    HW = H * W
    rows = B * HW

    wc, bc = params["wc"], params["bc"]
    w1, b1 = params["w1"], params["b1"]
    gamma, beta = params["gamma"], params["beta"]
    w2, b2 = params["w2"], params["b2"]

    F0 = wc.shape[0]              # backbone features (num_prev)
    NF = w2.shape[1]              # projection features (num_features)
    CKK = C * 9

    if normalize:
        assert B >= 2, "cross-batch normalize needs batch >= 2 (unbiased std)"

    # ---- lane-dense padded sizes (weights padded in lockstep with patches) ----
    KP = _round_up(CKK, 128)      # contraction dim of the conv matmul
    F0P = _round_up(F0, 128)      # backbone feature dim
    NFP = _round_up(NF, 128)      # projection feature dim

    # ---- host-side im2col (c major, (kh,kw) minor), flattened over batch ----
    patches = im2col_3x3_same(x).reshape(rows, CKK)
    patches = jnp.pad(patches, ((0, 0), (0, KP - CKK)))

    # Block-diagonal pooling matrix: pool[b, r] = 1/HW iff r belongs to batch b.
    pool = (jnp.arange(rows) // HW == jnp.arange(B)[:, None]).astype(
        jnp.float32) / HW                                        # [B, rows]

    # conv weight OIHW -> (C*9, F0), zero-padded; bias as a padded row.
    wc_mat = jnp.pad(wc.reshape(F0, CKK).T, ((0, KP - CKK), (0, F0P - F0)))
    bc_row = jnp.pad(bc[None, :], ((0, 0), (0, F0P - F0)))

    w1p = jnp.pad(w1, ((0, F0P - F0), (0, NFP - NF)))
    b1p = jnp.pad(b1[None, :], ((0, 0), (0, NFP - NF)))
    gp = jnp.pad(gamma[None, :], ((0, 0), (0, NFP - NF)))
    bep = jnp.pad(beta[None, :], ((0, 0), (0, NFP - NF)))
    w2p = jnp.pad(w2, ((0, NFP - NF), (0, NFP - NF)))
    b2p = jnp.pad(b2[None, :], ((0, 0), (0, NFP - NF)))

    TR = _pick_tile_rows(rows)
    num_tiles = rows // TR

    kern = functools.partial(_fused_kernel, batch=B, normalize=normalize)
    out = pl.pallas_call(
        kern,
        out_shape=jax.ShapeDtypeStruct((B, NFP), jnp.float32),
        grid_spec=pltpu.PrefetchScalarGridSpec(
            num_scalar_prefetch=0,
            grid=(num_tiles,),
            in_specs=[
                pl.BlockSpec((TR, KP), lambda t: (t, 0)),        # patches tile
                pl.BlockSpec((B, TR), lambda t: (0, t)),         # pooling tile
                pl.BlockSpec((KP, F0P), lambda t: (0, 0)),       # conv weight
                pl.BlockSpec((1, F0P), lambda t: (0, 0)),        # conv bias
                pl.BlockSpec((F0P, NFP), lambda t: (0, 0)),      # w1
                pl.BlockSpec((1, NFP), lambda t: (0, 0)),        # b1
                pl.BlockSpec((1, NFP), lambda t: (0, 0)),        # gamma
                pl.BlockSpec((1, NFP), lambda t: (0, 0)),        # beta
                pl.BlockSpec((NFP, NFP), lambda t: (0, 0)),      # w2
                pl.BlockSpec((1, NFP), lambda t: (0, 0)),        # b2
            ],
            out_specs=pl.BlockSpec((B, NFP), lambda t: (0, 0)),
            scratch_shapes=[pltpu.VMEM((B, F0P), jnp.float32)],  # GAP accumulator
        ),
        compiler_params=pltpu.CompilerParams(
            dimension_semantics=("arbitrary",)),                 # carries accumulator
    )(patches, pool, wc_mat, bc_row, w1p, b1p, gp, bep, w2p, b2p)

    return out[:, :NF] if NFP != NF else out


# ----------------------------------------------------------------------------
# Glue (plain JAX): im2col, parameter setup
# ----------------------------------------------------------------------------
def im2col_3x3_same(x):
    # x: [B, C, H, W] -> [B, H*W, C*9]  (patch feature order: c major, (kh,kw) minor)
    # TODO(synk): for large H,W move this into the kernel (9 shifted-slice matmuls)
    # to avoid the 9x HBM inflation of the materialized patch tensor.
    B, C, H, W = x.shape
    xp = jnp.pad(x, ((0, 0), (0, 0), (1, 1), (1, 1)))
    cols = [xp[:, :, i:i + H, j:j + W] for i in range(3) for j in range(3)]
    p = jnp.stack(cols, axis=2)                    # [B, C, 9, H, W]
    p = jnp.transpose(p, (0, 3, 4, 1, 2))          # [B, H, W, C, 9]
    return p.reshape(B, H * W, C * 9)


def init_params(key, c_in=3, num_prev=64, num_features=128):
    ks = jax.random.split(key, 6)
    wc = jax.random.normal(ks[0], (num_prev, c_in, 3, 3), jnp.float32) * 0.1   # OIHW
    bc = jax.random.normal(ks[1], (num_prev,), jnp.float32) * 0.1
    w1 = jax.random.normal(ks[2], (num_prev, num_features), jnp.float32) / (num_prev ** 0.5)
    b1 = jax.random.normal(ks[3], (num_features,), jnp.float32) * 0.1
    gamma = jnp.ones((num_features,), jnp.float32)       # BatchNorm1d default init
    beta = jnp.zeros((num_features,), jnp.float32)
    w2 = jax.random.normal(ks[4], (num_features, num_features), jnp.float32) / (num_features ** 0.5)
    b2 = jax.random.normal(ks[5], (num_features,), jnp.float32) * 0.1
    return dict(wc=wc, bc=bc, w1=w1, b1=b1, gamma=gamma, beta=beta, w2=w2, b2=b2)


# ----------------------------------------------------------------------------
# Pure-JAX reference (mirrors the PyTorch forward semantics) for verification
# ----------------------------------------------------------------------------
def reference_forward(x, params, normalize=False):
    conv = lax.conv_general_dilated(
        x, params["wc"], window_strides=(1, 1), padding="SAME",
        dimension_numbers=("NCHW", "OIHW", "NCHW"))
    conv = jnp.maximum(conv + params["bc"][None, :, None, None], 0.0)
    feats = jnp.mean(conv, axis=(2, 3))                            # global avg pool
    h = feats @ params["w1"] + params["b1"]
    mu = h.mean(0)
    var = ((h - mu) ** 2).mean(0)
    h = (h - mu) / jnp.sqrt(var + BN_EPS) * params["gamma"] + params["beta"]
    h = jnp.maximum(h, 0.0)
    o = h @ params["w2"] + params["b2"]
    if normalize:
        o = (o - o.mean(0)) / o.std(0, ddof=1)                     # torch std: unbiased
    return o


if __name__ == "__main__":
    key = jax.random.PRNGKey(0)
    kx, kp = jax.random.split(key)

    B, C, H, W = 8, 3, 16, 16
    x = jax.random.normal(kx, (B, C, H, W), jnp.float32)
    params = init_params(kp, c_in=C, num_prev=64, num_features=128)

    out = jax.block_until_ready(barlow_twins_forward(x, params, normalize=False))
    out_norm = jax.block_until_ready(barlow_twins_forward(x, params, normalize=True))

    ref = reference_forward(x, params, normalize=False)
    ref_norm = reference_forward(x, params, normalize=True)

    assert out.shape == (B, 128) and out_norm.shape == (B, 128)
    assert jnp.allclose(out, ref, rtol=1e-3, atol=1e-3)
    assert jnp.allclose(out_norm, ref_norm, rtol=1e-3, atol=1e-3)

    print("KERNEL_OK")
</pallas_src>

<mosaic_0001>
module attributes {stable_mosaic.version = 11 : i64} {
  func.func @_fused_kernel(%arg0: i32, %arg1: memref<2048x128xf32, #tpu.memory_space<vmem>>, %arg2: memref<8x2048xf32, #tpu.memory_space<vmem>>, %arg3: memref<128x128xf32, #tpu.memory_space<vmem>>, %arg4: memref<1x128xf32, #tpu.memory_space<vmem>>, %arg5: memref<128x128xf32, #tpu.memory_space<vmem>>, %arg6: memref<1x128xf32, #tpu.memory_space<vmem>>, %arg7: memref<1x128xf32, #tpu.memory_space<vmem>>, %arg8: memref<1x128xf32, #tpu.memory_space<vmem>>, %arg9: memref<128x128xf32, #tpu.memory_space<vmem>>, %arg10: memref<1x128xf32, #tpu.memory_space<vmem>>, %arg11: memref<8x128xf32, #tpu.memory_space<vmem>>, %arg12: memref<8x128xf32, #tpu.memory_space<vmem>>) attributes {dimension_semantics = [#tpu.dimension_semantics<arbitrary>], iteration_bounds = array<i64: 1>, scalar_prefetch = 0 : i64, scratch_operands = 1 : i64, tpu.core_type = #tpu.core_type<tc>, window_params = [{transform_indices = @transform_0, window_bounds = array<i64: 2048, 128>}, {transform_indices = @transform_1, window_bounds = array<i64: 8, 2048>}, {pipeline_mode = #tpu.pipeline_mode<synchronous>, transform_indices = @transform_2, window_bounds = array<i64: 128, 128>}, {pipeline_mode = #tpu.pipeline_mode<synchronous>, transform_indices = @transform_3, window_bounds = array<i64: 1, 128>}, {pipeline_mode = #tpu.pipeline_mode<synchronous>, transform_indices = @transform_4, window_bounds = array<i64: 128, 128>}, {pipeline_mode = #tpu.pipeline_mode<synchronous>, transform_indices = @transform_5, window_bounds = array<i64: 1, 128>}, {pipeline_mode = #tpu.pipeline_mode<synchronous>, transform_indices = @transform_6, window_bounds = array<i64: 1, 128>}, {pipeline_mode = #tpu.pipeline_mode<synchronous>, transform_indices = @transform_7, window_bounds = array<i64: 1, 128>}, {pipeline_mode = #tpu.pipeline_mode<synchronous>, transform_indices = @transform_8, window_bounds = array<i64: 128, 128>}, {pipeline_mode = #tpu.pipeline_mode<synchronous>, transform_indices = @transform_9, window_bounds = array<i64: 1, 128>}, {pipeline_mode = #tpu.pipeline_mode<synchronous>, transform_indices = @transform_10, window_bounds = array<i64: 8, 128>}]} {
    %c0_i32 = arith.constant 0 : i32
    %0 = arith.cmpi eq, %arg0, %c0_i32 : i32
    %1 = arith.extui %0 : i1 to i32
    %c0_i32_0 = arith.constant 0 : i32
    %2 = arith.cmpi ne, %1, %c0_i32_0 : i32
    scf.if %2 {
      %cst_16 = arith.constant 0.000000e+00 : f32
      %19 = vector.broadcast %cst_16 : f32 to vector<8x128xf32>
      %c0_17 = arith.constant 0 : index
      %c0_18 = arith.constant 0 : index
      %20 = vector.load %arg12[%c0_17, %c0_18] : memref<8x128xf32, #tpu.memory_space<vmem>>, vector<8x128xf32>
      tpu.vector_store %arg12[%c0_17, %c0_18], %19 {strides = array<i32>} : memref<8x128xf32, #tpu.memory_space<vmem>>, vector<8x128xf32>,
    } else {
    }
    %c0 = arith.constant 0 : index
    %c0_1 = arith.constant 0 : index
    %3 = vector.load %arg1[%c0, %c0_1] : memref<2048x128xf32, #tpu.memory_space<vmem>>, vector<2048x128xf32>
    %c0_2 = arith.constant 0 : index
    %c0_3 = arith.constant 0 : index
    %4 = vector.load %arg3[%c0_2, %c0_3] : memref<128x128xf32, #tpu.memory_space<vmem>>, vector<128x128xf32>
    %cst = arith.constant dense<0.000000e+00> : vector<2048x128xf32>
    %5 = tpu.matmul %3, %4, %cst {dimension_numbers = #tpu.dot_dimension_numbers<[1], [0], [0], [1], [0, 0, 1, 1], [], []>} : vector<2048x128xf32>, vector<128x128xf32>, vector<2048x128xf32> -> vector<2048x128xf32>
    %c0_4 = arith.constant 0 : index
    %c0_5 = arith.constant 0 : index
    %6 = vector.load %arg4[%c0_4, %c0_5] : memref<1x128xf32, #tpu.memory_space<vmem>>, vector<1x128xf32>
    %7 = vector.broadcast %6 : vector<1x128xf32> to vector<2048x128xf32>
    %8 = arith.addf %5, %7 : vector<2048x128xf32>
    %cst_6 = arith.constant 0.000000e+00 : f32
    %9 = vector.broadcast %cst_6 : f32 to vector<2048x128xf32>
    %10 = arith.maximumf %8, %9 : vector<2048x128xf32>
    %c0_7 = arith.constant 0 : index
    %c0_8 = arith.constant 0 : index
    %11 = vector.load %arg12[%c0_7, %c0_8] : memref<8x128xf32, #tpu.memory_space<vmem>>, vector<8x128xf32>
    %c0_9 = arith.constant 0 : index
    %c0_10 = arith.constant 0 : index
    %12 = vector.load %arg2[%c0_9, %c0_10] : memref<8x2048xf32, #tpu.memory_space<vmem>>, vector<8x2048xf32>
    %cst_11 = arith.constant dense<0.000000e+00> : vector<8x128xf32>
    %13 = tpu.matmul %12, %10, %cst_11 {dimension_numbers = #tpu.dot_dimension_numbers<[1], [0], [0], [1], [0, 0, 1, 1], [], []>} : vector<8x2048xf32>, vector<2048x128xf32>, vector<8x128xf32> -> vector<8x128xf32>
    %14 = arith.addf %11, %13 : vector<8x128xf32>
    %c0_12 = arith.constant 0 : index
    %c0_13 = arith.constant 0 : index
    %15 = vector.load %arg12[%c0_12, %c0_13] : memref<8x128xf32, #tpu.memory_space<vmem>>, vector<8x128xf32>
    tpu.vector_store %arg12[%c0_12, %c0_13], %14 {strides = array<i32>} : memref<8x128xf32, #tpu.memory_space<vmem>>, vector<8x128xf32>,
    %c0_i32_14 = arith.constant 0 : i32
    %16 = arith.cmpi eq, %arg0, %c0_i32_14 : i32
    %17 = arith.extui %16 : i1 to i32
    %c0_i32_15 = arith.constant 0 : i32
    %18 = arith.cmpi ne, %17, %c0_i32_15 : i32
    scf.if %18 {
      %c0_16 = arith.constant 0 : index
      %c0_17 = arith.constant 0 : index
      %19 = vector.load %arg12[%c0_16, %c0_17] : memref<8x128xf32, #tpu.memory_space<vmem>>, vector<8x128xf32>
      %c0_18 = arith.constant 0 : index
      %c0_19 = arith.constant 0 : index
      %20 = vector.load %arg5[%c0_18, %c0_19] : memref<128x128xf32, #tpu.memory_space<vmem>>, vector<128x128xf32>
      %cst_20 = arith.constant dense<0.000000e+00> : vector<8x128xf32>
      %21 = tpu.matmul %19, %20, %cst_20 {dimension_numbers = #tpu.dot_dimension_numbers<[1], [0], [0], [1], [0, 0, 1, 1], [], []>} : vector<8x128xf32>, vector<128x128xf32>, vector<8x128xf32> -> vector<8x128xf32>
      %c0_21 = arith.constant 0 : index
      %c0_22 = arith.constant 0 : index
      %22 = vector.load %arg6[%c0_21, %c0_22] : memref<1x128xf32, #tpu.memory_space<vmem>>, vector<1x128xf32>
      %23 = vector.broadcast %22 : vector<1x128xf32> to vector<8x128xf32>
      %24 = arith.addf %21, %23 : vector<8x128xf32>
      %cst_23 = arith.constant dense<0.000000e+00> : vector<128xf32>
      %25 = vector.multi_reduction <add>, %24, %cst_23 [0] : vector<8x128xf32> to vector<128xf32>
      %26 = vector.shape_cast %25 : vector<128xf32> to vector<1x128xf32>
      %cst_24 = arith.constant 8.000000e+00 : f32
      %27 = vector.broadcast %cst_24 : f32 to vector<1x128xf32>
      %28 = arith.divf %26, %27 : vector<1x128xf32>
      %29 = vector.broadcast %28 : vector<1x128xf32> to vector<8x128xf32>
      %30 = arith.subf %24, %29 : vector<8x128xf32>
      %31 = arith.mulf %30, %30 : vector<8x128xf32>
      %cst_25 = arith.constant dense<0.000000e+00> : vector<128xf32>
      %32 = vector.multi_reduction <add>, %31, %cst_25 [0] : vector<8x128xf32> to vector<128xf32>
      %33 = vector.shape_cast %32 : vector<128xf32> to vector<1x128xf32>
      %cst_26 = arith.constant 8.000000e+00 : f32
      %34 = vector.broadcast %cst_26 : f32 to vector<1x128xf32>
      %35 = arith.divf %33, %34 : vector<1x128xf32>
      %36 = vector.broadcast %28 : vector<1x128xf32> to vector<8x128xf32>
      %37 = arith.subf %24, %36 : vector<8x128xf32>
      %cst_27 = arith.constant 9.99999974E-6 : f32
      %38 = vector.broadcast %cst_27 : f32 to vector<1x128xf32>
      %39 = arith.addf %35, %38 : vector<1x128xf32>
      %40 = math.rsqrt %39 : vector<1x128xf32>
      %41 = vector.broadcast %40 : vector<1x128xf32> to vector<8x128xf32>
      %42 = arith.mulf %37, %41 : vector<8x128xf32>
      %c0_28 = arith.constant 0 : index
      %c0_29 = arith.constant 0 : index
      %43 = vector.load %arg7[%c0_28, %c0_29] : memref<1x128xf32, #tpu.memory_space<vmem>>, vector<1x128xf32>
      %44 = vector.broadcast %43 : vector<1x128xf32> to vector<8x128xf32>
      %45 = arith.mulf %42, %44 : vector<8x128xf32>
      %c0_30 = arith.constant 0 : index
      %c0_31 = arith.constant 0 : index
      %46 = vector.load %arg8[%c0_30, %c0_31] : memref<1x128xf32, #tpu.memory_space<vmem>>, vector<1x128xf32>
      %47 = vector.broadcast %46 : vector<1x128xf32> to vector<8x128xf32>
      %48 = arith.addf %45, %47 : vector<8x128xf32>
      %cst_32 = arith.constant 0.000000e+00 : f32
      %49 = vector.broadcast %cst_32 : f32 to vector<8x128xf32>
      %50 = arith.maximumf %48, %49 : vector<8x128xf32>
      %c0_33 = arith.constant 0 : index
      %c0_34 = arith.constant 0 : index
      %51 = vector.load %arg9[%c0_33, %c0_34] : memref<128x128xf32, #tpu.memory_space<vmem>>, vector<128x128xf32>
      %cst_35 = arith.constant dense<0.000000e+00> : vector<8x128xf32>
      %52 = tpu.matmul %50, %51, %cst_35 {dimension_numbers = #tpu.dot_dimension_numbers<[1], [0], [0], [1], [0, 0, 1, 1], [], []>} : vector<8x128xf32>, vector<128x128xf32>, vector<8x128xf32> -> vector<8x128xf32>
      %c0_36 = arith.constant 0 : index
      %c0_37 = arith.constant 0 : index
      %53 = vector.load %arg10[%c0_36, %c0_37] : memref<1x128xf32, #tpu.memory_space<vmem>>, vector<1x128xf32>
      %54 = vector.broadcast %53 : vector<1x128xf32> to vector<8x128xf32>
      %55 = arith.addf %52, %54 : vector<8x128xf32>
      %c0_38 = arith.constant 0 : index
      %c0_39 = arith.constant 0 : index
      %56 = vector.load %arg11[%c0_38, %c0_39] : memref<8x128xf32, #tpu.memory_space<vmem>>, vector<8x128xf32>
      tpu.vector_store %arg11[%c0_38, %c0_39], %55 {strides = array<i32>} : memref<8x128xf32, #tpu.memory_space<vmem>>, vector<8x128xf32>,
    } else {
    }
    return
  }
  func.func @transform_0(%arg0: i32) -> (i32, i32) {
    %c0_i32 = arith.constant 0 : i32
    %c0_i32_0 = arith.constant 0 : i32
    return %arg0, %c0_i32 : i32, i32
  }
  func.func @transform_1(%arg0: i32) -> (i32, i32) {
    %c0_i32 = arith.constant 0 : i32
    %c0_i32_0 = arith.constant 0 : i32
    return %c0_i32, %arg0 : i32, i32
  }
  func.func @transform_2(%arg0: i32) -> (i32, i32) {
    %c0_i32 = arith.constant 0 : i32
    %c0_i32_0 = arith.constant 0 : i32
    %c0_i32_1 = arith.constant 0 : i32
    return %c0_i32, %c0_i32_0 : i32, i32
  }
  func.func @transform_3(%arg0: i32) -> (i32, i32) {
    %c0_i32 = arith.constant 0 : i32
    %c0_i32_0 = arith.constant 0 : i32
    %c0_i32_1 = arith.constant 0 : i32
    return %c0_i32, %c0_i32_0 : i32, i32
  }
  func.func @transform_4(%arg0: i32) -> (i32, i32) {
    %c0_i32 = arith.constant 0 : i32
    %c0_i32_0 = arith.constant 0 : i32
    %c0_i32_1 = arith.constant 0 : i32
    return %c0_i32, %c0_i32_0 : i32, i32
  }
  func.func @transform_5(%arg0: i32) -> (i32, i32) {
    %c0_i32 = arith.constant 0 : i32
    %c0_i32_0 = arith.constant 0 : i32
    %c0_i32_1 = arith.constant 0 : i32
    return %c0_i32, %c0_i32_0 : i32, i32
  }
  func.func @transform_6(%arg0: i32) -> (i32, i32) {
    %c0_i32 = arith.constant 0 : i32
    %c0_i32_0 = arith.constant 0 : i32
    %c0_i32_1 = arith.constant 0 : i32
    return %c0_i32, %c0_i32_0 : i32, i32
  }
  func.func @transform_7(%arg0: i32) -> (i32, i32) {
    %c0_i32 = arith.constant 0 : i32
    %c0_i32_0 = arith.constant 0 : i32
    %c0_i32_1 = arith.constant 0 : i32
    return %c0_i32, %c0_i32_0 : i32, i32
  }
  func.func @transform_8(%arg0: i32) -> (i32, i32) {
    %c0_i32 = arith.constant 0 : i32
    %c0_i32_0 = arith.constant 0 : i32
    %c0_i32_1 = arith.constant 0 : i32
    return %c0_i32, %c0_i32_0 : i32, i32
  }
  func.func @transform_9(%arg0: i32) -> (i32, i32) {
    %c0_i32 = arith.constant 0 : i32
    %c0_i32_0 = arith.constant 0 : i32
    %c0_i32_1 = arith.constant 0 : i32
    return %c0_i32, %c0_i32_0 : i32, i32
  }
  func.func @transform_10(%arg0: i32) -> (i32, i32) {
    %c0_i32 = arith.constant 0 : i32
    %c0_i32_0 = arith.constant 0 : i32
    %c0_i32_1 = arith.constant 0 : i32
    return %c0_i32, %c0_i32_0 : i32, i32
  }
}

</mosaic_0001>

<bundles_post_ra>
// kernel: tpu_custom_call.1
= control target key start
LH: loop header
LB: loop body
LE: loop exit
PB: predicated region body
PF: predicated region fallthrough
CT: control target
= control target key end

     0   :  { %15 = vsyncpa [#allocation4], 0  ;;  %s5028_s0 = inlined_call_operand.hbm [shape: f32[2048,128], index: 0, kind: input, shape index: {}]   ;;  %s5029_s1 = inlined_call_operand.hbm [shape: f32[8,2048], index: 1, kind: input, shape index: {}]   ;;  %s5030_s2 = inlined_call_operand.hbm [shape: f32[128,128], index: 2, kind: input, shape index: {}]   ;;  %s5031_s3 = inlined_call_operand.vmem [shape: f32[1,128], index: 3, kind: input, shape index: {}]   ;;  %s5032_s4 = inlined_call_operand.hbm [shape: f32[128,128], index: 4, kind: input, shape index: {}]   ;;  %s5033_s5 = inlined_call_operand.vmem [shape: f32[1,128], index: 5, kind: input, shape index: {}]   ;;  %s5034_s6 = inlined_call_operand.vmem [shape: f32[1,128], index: 6, kind: input, shape index: {}]   ;;  %s5035_s7 = inlined_call_operand.vmem [shape: f32[1,128], index: 7, kind: input, shape index: {}]   ;;  %s5036_s8 = inlined_call_operand.hbm [shape: f32[128,128], index: 8, kind: input, shape index: {}]   ;;  %s5037_s9 = inlined_call_operand.vmem [shape: f32[1,128], index: 9, kind: input, shape index: {}]   ;;  %s5038_s10 = inlined_call_operand.hbm [shape: f32[8,128], index: 10, kind: output, shape index: {}]  }
   0x1   :  { %16 = vsyncpa [#allocation7], 0 }
   0x2   :  { %17 = vsyncpa [#allocation10], 0 }
   0x3   :  { %18 = vsyncpa [#allocation5], 0  ;;  %s4062_s13 = smov [#allocation6]  }
   0x4   :  { %s37_s14 = sshll.u32 %s4062_s13, 4  ;;  %s38_s14 = int_to_ptr.vmem [resolvable:$true] %s37_s14 }
   0x5   :  { %s3942_s15 = scalar_lea.vmem %s38_s14, 2048  ;;  %p3947_p1 = scmp.lt.s32.totalorder %s38_s14, %s38_s14 }
   0x6   :  { %p3943_p0 = scmp.ne.s32.totalorder %s38_s14, %s3942_s15  ;;  %p3948_p2 = scmp.lt.s32.totalorder %s3942_s15, %s3942_s15 }
   0x8   :  { %p3949_p3 = por %p3948_p2, %p3947_p1 }
   0xa   :  { %p3950_p4 = pnand %p3949_p3, %p3943_p0 }
   0xc   :  { %3953 = shalt.err (!%p3950_p4)
}
   0xd   :  { %40 = dma.hbm_to_vmem [thread:$0]  %s5029_s1, 2048, %s38_s14, [#allocation7]  }
   0xe   :  { %s4063_s18 = smov [#allocation9]   ;;  %s4064_s20 = smov [#allocation3]  }
   0xf   :  { %s60_s19 = sshll.u32 %s4063_s18, 4  ;;  %s24_s21 = sshll.u32 %s4064_s20, 4  ;;  %s61_s19 = int_to_ptr.vmem [resolvable:$true] %s60_s19  ;;  %s25_s21 = int_to_ptr.vmem [resolvable:$true] %s24_s21 }
  0x10   :  { %s3962_s22 = scalar_lea.vmem %s61_s19, 2048  ;;  %p3967_p6 = scmp.lt.s32.totalorder %s61_s19, %s61_s19 }
  0x11   :  { %p3963_p5 = scmp.ne.s32.totalorder %s61_s19, %s3962_s22  ;;  %p3968_p7 = scmp.lt.s32.totalorder %s3962_s22, %s3962_s22 }
  0x13   :  { %p3969_p8 = por %p3968_p7, %p3967_p6 }
  0x15   :  { %p3970_p9 = pnand %p3969_p8, %p3963_p5 }
  0x17   :  { %3973 = shalt.err (!%p3970_p9)
}
  0x18   :  { %s4065_s23 = smov 128   ;;  %s4066_s24 = smov 8  }
  0x19   :  { %66 = dma.hbm_to_vmem [thread:$0]  %s5032_s4, 2048, %s61_s19, [#allocation10], %s4065_s23, %s4065_s23, %s4066_s24  }
  0x1a   :  { %s3982_s1 = scalar_lea.vmem %s25_s21, 32768  ;;  %p3987_p11 = scmp.lt.s32.totalorder %s25_s21, %s25_s21 }
  0x1b   :  { %p3983_p10 = scmp.ne.s32.totalorder %s25_s21, %s3982_s1  ;;  %p3988_p12 = scmp.lt.s32.totalorder %s3982_s1, %s3982_s1 }
  0x1d   :  { %p3989_p13 = por %p3988_p12, %p3987_p11 }
  0x1f   :  { %p3990_p0 = pnand %p3989_p13, %p3983_p10 }
  0x21   :  { %3993 = shalt.err (!%p3990_p0)
}
  0x22   :  { %30 = dma.hbm_to_vmem [thread:$0]  %s5028_s0, 32768, %s25_s21, [#allocation4], %s4065_s23, %s4065_s23, %s4066_s24  }
  0x23   :  { %s4067_s29 = smov [#allocation8]   ;;  %s4068_s11 = smov [#allocation11]  }
  0x24   :  { %s46_s30 = sshll.u32 %s4067_s29, 4  ;;  %s78_s4 = sshll.u32 %s4068_s11, 4  ;;  %s47_s30 = int_to_ptr.vmem [resolvable:$true] %s46_s30  ;;  %s79_s4 = int_to_ptr.vmem [resolvable:$true] %s78_s4 }
  0x25   :  { %s4002_s12 = scalar_lea.vmem %s47_s30, 2048  ;;  %p4007_p2 = scmp.lt.s32.totalorder %s47_s30, %s47_s30 }
  0x26   :  { %p4003_p1 = scmp.ne.s32.totalorder %s47_s30, %s4002_s12  ;;  %p4008_p3 = scmp.lt.s32.totalorder %s4002_s12, %s4002_s12 }
  0x28   :  { %p4009_p4 = por %p4008_p3, %p4007_p2 }
  0x2a   :  { %p4010_p5 = pnand %p4009_p4, %p4003_p1 }
  0x2c   :  { %4013 = shalt.err (!%p4010_p5)
}
  0x2d   :  { %52 = dma.hbm_to_vmem [thread:$0]  %s5030_s2, 2048, %s47_s30, [#allocation7], %s4065_s23, %s4065_s23, %s4066_s24  }
  0x2e   :  { %s4022_s0 = scalar_lea.vmem %s79_s4, 2048  ;;  %p4027_p7 = scmp.lt.s32.totalorder %s79_s4, %s79_s4 }
  0x2f   :  { %p4023_p6 = scmp.ne.s32.totalorder %s79_s4, %s4022_s0  ;;  %p4028_p8 = scmp.lt.s32.totalorder %s4022_s0, %s4022_s0 }
  0x31   :  { %p4029_p9 = por %p4028_p8, %p4027_p7 }
  0x33   :  { %p4030_p10 = pnand %p4029_p9, %p4023_p6 }
  0x35   :  { %4033 = shalt.err (!%p4030_p10)
}
  0x36   :  { %84 = dma.hbm_to_vmem [thread:$0]  %s5036_s8, 2048, %s79_s4, [#allocation10], %s4065_s23, %s4065_s23, %s4066_s24  }
  0x37   :  { %4054 = dma.done.wait [#allocation4], 32768  }
  0x38   :  { %4055 = vsyncadd [#allocation4], 4294934528 }
  0x39   :  { %4056 = dma.done.wait [#allocation7], 4096  }
  0x3a   :  { %4057 = vsyncadd [#allocation7], 4294963200 }
  0x3b   :  { %4058 = dma.done.wait [#allocation10], 4096  }
  0x3c   :  { %4059 = vsyncadd [#allocation10], 4294963200  ;;  %v378_v0 = vld [vmem:[#allocation8 + $0x78] sm:$0xff]  ;;  %v377_v1 = vld [vmem:[#allocation8 + $0x70] sm:$0xff]  ;;  %vm4070_vm0 = vmmov 0   ;;  %s4071_s1 = smov [#allocation12]  }
  0x3d   :  { %3402 = vmatprep.subr.mxu0 %v378_v0  ;;  %3888 = vmatprep.subr.mxu1 %v378_v0  ;;  %v376_v2 = vld [vmem:[#allocation8 + $0x68] sm:$0xff]  ;;  %v375_v3 = vld [vmem:[#allocation8 + $0x60] sm:$0xff]  ;;  %v374_v5 = vld [vmem:[#allocation8 + $0x58] sm:$0xff]  ;;  %s2800_s27 = sshll.u32 %s4071_s1, 4  ;;  %s2801_s27 = int_to_ptr.vmem [resolvable:$true] %s2800_s27 }
  0x3e   :  { %3403 = vmatpush3.msra.mxu0 %v378_v0  ;;  %3904 = vmatpush3.msra.mxu1 %v378_v0  ;;  %v107_v4 = vld [vmem:[#allocation3] sm:$0xff]  ;;  %v373_v6 = vld [vmem:[#allocation8 + $0x50] sm:$0xff]  ;;  %v372_v7 = vld [vmem:[#allocation8 + $0x48] sm:$0xff]  ;;  %p4039_p12 = scmp.lt.s32.totalorder %s2801_s27, %s2801_s27 }
  0x3f   :  { %3404 = vmatprep.subr.mxu0 %v377_v1  ;;  %3889 = vmatprep.subr.mxu1 %v377_v1  ;;  %v371_v8 = vld [vmem:[#allocation8 + $0x40] sm:$0xff]  ;;  %v370_v9 = vld [vmem:[#allocation8 + $0x38] sm:$0xff]  ;;  %v369_v10 = vld [vmem:[#allocation8 + $0x30] sm:$0xff] }
  0x40   :  { %3405 = vmatpush3.msra.mxu0 %v377_v1  ;;  %3905 = vmatpush3.msra.mxu1 %v377_v1  ;;  %v368_v11 = vld [vmem:[#allocation8 + $0x28] sm:$0xff]  ;;  %v367_v12 = vld [vmem:[#allocation8 + $0x20] sm:$0xff]  ;;  %v366_v13 = vld [vmem:[#allocation8 + $0x18] sm:$0xff] }
  0x41   :  { %3406 = vmatprep.subr.mxu0 %v376_v2  ;;  %3890 = vmatprep.subr.mxu1 %v376_v2  ;;  %v365_v14 = vld [vmem:[#allocation8 + $0x10] sm:$0xff]  ;;  %v364_v15 = vld [vmem:[#allocation8 + $0x8] sm:$0xff]  ;;  %v363_v16 = vld [vmem:[#allocation8] sm:$0xff] }
  0x42   :  { %3407 = vmatpush3.msra.mxu0 %v376_v2  ;;  %3434 = vmatprep.mubr.f32.mxu0 %v107_v4  ;;  %v108_v17 = vld [vmem:[#allocation3 + $0x8] sm:$0xff]  ;;  %v109_v18 = vld [vmem:[#allocation3 + $0x10] sm:$0xff]  ;;  %v110_v19 = vld [vmem:[#allocation3 + $0x18] sm:$0xff] }
  0x43   :  { %3408 = vmatprep.subr.mxu0 %v375_v3  ;;  %3906 = vmatpush3.msra.mxu1 %v376_v2  ;;  %v111_v20 = vld [vmem:[#allocation3 + $0x20] sm:$0xff]  ;;  %v112_v21 = vld [vmem:[#allocation3 + $0x28] sm:$0xff]  ;;  %v113_v22 = vld [vmem:[#allocation3 + $0x30] sm:$0xff] }
  0x44   :  { %3409 = vmatpush3.msra.mxu0 %v375_v3  ;;  %3891 = vmatprep.subr.mxu1 %v375_v3  ;;  %v114_v23 = vld [vmem:[#allocation3 + $0x38] sm:$0xff]  ;;  %v115_v24 = vld [vmem:[#allocation3 + $0x40] sm:$0xff]  ;;  %v116_v25 = vld [vmem:[#allocation3 + $0x48] sm:$0xff] }
  0x45   :  { %3410 = vmatprep.subr.mxu0 %v374_v5  ;;  %3907 = vmatpush3.msra.mxu1 %v375_v3  ;;  %v117_v26 = vld [vmem:[#allocation3 + $0x50] sm:$0xff]  ;;  %v118_v27 = vld [vmem:[#allocation3 + $0x58] sm:$0xff]  ;;  %v119_v28 = vld [vmem:[#allocation3 + $0x60] sm:$0xff] }
  0x46   :  { %3411 = vmatpush3.msra.mxu0 %v374_v5  ;;  %3892 = vmatprep.subr.mxu1 %v374_v5  ;;  %v120_v29 = vld [vmem:[#allocation3 + $0x68] sm:$0xff]  ;;  %v121_v30 = vld [vmem:[#allocation3 + $0x70] sm:$0xff]  ;;  %v122_v31 = vld [vmem:[#allocation3 + $0x78] sm:$0xff] }
  0x47   :  { %3412 = vmatprep.subr.mxu0 %v373_v6  ;;  %3908 = vmatpush3.msra.mxu1 %v374_v5  ;;  %v123_v32 = vld [vmem:[#allocation3 + $0x80] sm:$0xff]  ;;  %v124_v33 = vld [vmem:[#allocation3 + $0x88] sm:$0xff]  ;;  %v125_v34 = vld [vmem:[#allocation3 + $0x90] sm:$0xff] }
  0x48   :  { %3413 = vmatpush3.msra.mxu0 %v373_v6  ;;  %3893 = vmatprep.subr.mxu1 %v373_v6  ;;  %v126_v35 = vld [vmem:[#allocation3 + $0x98] sm:$0xff]  ;;  %v127_v36 = vld [vmem:[#allocation3 + $0xa0] sm:$0xff]  ;;  %v128_v37 = vld [vmem:[#allocation3 + $0xa8] sm:$0xff] }
  0x49   :  { %3414 = vmatprep.subr.mxu0 %v372_v7  ;;  %3909 = vmatpush3.msra.mxu1 %v373_v6  ;;  %v129_v38 = vld [vmem:[#allocation3 + $0xb0] sm:$0xff]  ;;  %v130_v39 = vld [vmem:[#allocation3 + $0xb8] sm:$0xff]  ;;  %v131_v40 = vld [vmem:[#allocation3 + $0xc0] sm:$0xff] }
  0x4a   :  { %3415 = vmatpush3.msra.mxu0 %v372_v7  ;;  %3894 = vmatprep.subr.mxu1 %v372_v7  ;;  %v132_v41 = vld [vmem:[#allocation3 + $0xc8] sm:$0xff]  ;;  %v133_v42 = vld [vmem:[#allocation3 + $0xd0] sm:$0xff]  ;;  %v134_v43 = vld [vmem:[#allocation3 + $0xd8] sm:$0xff] }
  0x4b   :  { %3416 = vmatprep.subr.mxu0 %v371_v8  ;;  %3910 = vmatpush3.msra.mxu1 %v372_v7  ;;  %v135_v44 = vld [vmem:[#allocation3 + $0xe0] sm:$0xff]  ;;  %v136_v45 = vld [vmem:[#allocation3 + $0xe8] sm:$0xff]  ;;  %v137_v46 = vld [vmem:[#allocation3 + $0xf0] sm:$0xff] }
  0x4c   :  { %3417 = vmatpush3.msra.mxu0 %v371_v8  ;;  %3895 = vmatprep.subr.mxu1 %v371_v8  ;;  %v138_v47 = vld [vmem:[#allocation3 + $0xf8] sm:$0xff]  ;;  %v139_v48 = vld [vmem:[#allocation3 + $0x100] sm:$0xff]  ;;  %v140_v49 = vld [vmem:[#allocation3 + $0x108] sm:$0xff] }
  0x4d   :  { %3418 = vmatprep.subr.mxu0 %v370_v9  ;;  %3911 = vmatpush3.msra.mxu1 %v371_v8  ;;  %v141_v50 = vld [vmem:[#allocation3 + $0x110] sm:$0xff]  ;;  %v142_v51 = vld [vmem:[#allocation3 + $0x118] sm:$0xff]  ;;  %v143_v52 = vld [vmem:[#allocation3 + $0x120] sm:$0xff] }
  0x4e   :  { %3419 = vmatpush3.msra.mxu0 %v370_v9  ;;  %3896 = vmatprep.subr.mxu1 %v370_v9  ;;  %v144_v53 = vld [vmem:[#allocation3 + $0x128] sm:$0xff]  ;;  %v145_v54 = vld [vmem:[#allocation3 + $0x130] sm:$0xff]  ;;  %v146_v55 = vld [vmem:[#allocation3 + $0x138] sm:$0xff] }
  0x4f   :  { %3420 = vmatprep.subr.mxu0 %v369_v10  ;;  %3912 = vmatpush3.msra.mxu1 %v370_v9  ;;  %v147_v56 = vld [vmem:[#allocation3 + $0x140] sm:$0xff]  ;;  %v148_v57 = vld [vmem:[#allocation3 + $0x148] sm:$0xff]  ;;  %v149_v58 = vld [vmem:[#allocation3 + $0x150] sm:$0xff] }
  0x50   :  { %3421 = vmatpush3.msra.mxu0 %v369_v10  ;;  %3897 = vmatprep.subr.mxu1 %v369_v10  ;;  %v150_v59 = vld [vmem:[#allocation3 + $0x158] sm:$0xff]  ;;  %v151_v60 = vld [vmem:[#allocation3 + $0x160] sm:$0xff]  ;;  %v309_v61 = vld [vmem:[#allocation3 + $0x650] sm:$0xff] }
  0x51   :  { %3422 = vmatprep.subr.mxu0 %v368_v11  ;;  %3913 = vmatpush3.msra.mxu1 %v369_v10  ;;  %v152_v62 = vld [vmem:[#allocation3 + $0x168] sm:$0xff]  ;;  %v310_v63 = vld [vmem:[#allocation3 + $0x658] sm:$0xff]  ;;  %v153_v0 = vld [vmem:[#allocation3 + $0x170] sm:$0xff] }
  0x52   :  { %3423 = vmatpush3.msra.mxu0 %v368_v11  ;;  %3898 = vmatprep.subr.mxu1 %v368_v11  ;;  %v311_v1 = vld [vmem:[#allocation3 + $0x660] sm:$0xff]  ;;  %v154_v2 = vld [vmem:[#allocation3 + $0x178] sm:$0xff]  ;;  %v312_v3 = vld [vmem:[#allocation3 + $0x668] sm:$0xff] }
  0x53   :  { %3424 = vmatprep.subr.mxu0 %v367_v12  ;;  %3914 = vmatpush3.msra.mxu1 %v368_v11  ;;  %v155_v4 = vld [vmem:[#allocation3 + $0x180] sm:$0xff]  ;;  %v313_v5 = vld [vmem:[#allocation3 + $0x670] sm:$0xff]  ;;  %v156_v6 = vld [vmem:[#allocation3 + $0x188] sm:$0xff] }
  0x54   :  { %3425 = vmatpush3.msra.mxu0 %v367_v12  ;;  %3899 = vmatprep.subr.mxu1 %v367_v12  ;;  %v314_v7 = vld [vmem:[#allocation3 + $0x678] sm:$0xff]  ;;  %v157_v8 = vld [vmem:[#allocation3 + $0x190] sm:$0xff]  ;;  %v315_v9 = vld [vmem:[#allocation3 + $0x680] sm:$0xff] }
  0x55   :  { %3426 = vmatprep.subr.mxu0 %v366_v13  ;;  %3915 = vmatpush3.msra.mxu1 %v367_v12  ;;  %v158_v10 = vld [vmem:[#allocation3 + $0x198] sm:$0xff]  ;;  %v316_v11 = vld [vmem:[#allocation3 + $0x688] sm:$0xff]  ;;  %v159_v12 = vld [vmem:[#allocation3 + $0x1a0] sm:$0xff] }
  0x56   :  { %3427 = vmatpush3.msra.mxu0 %v366_v13  ;;  %3900 = vmatprep.subr.mxu1 %v366_v13 }
  0x57   :  { %3428 = vmatprep.subr.mxu0 %v365_v14  ;;  %3916 = vmatpush3.msra.mxu1 %v366_v13  ;;  %v317_v13 = vld [vmem:[#allocation3 + $0x690] sm:$0xff] }
  0x58   :  { %3429 = vmatpush3.msra.mxu0 %v365_v14  ;;  %3901 = vmatprep.subr.mxu1 %v365_v14 }
  0x59   :  { %3430 = vmatprep.subr.mxu0 %v364_v15  ;;  %3917 = vmatpush3.msra.mxu1 %v365_v14  ;;  %v160_v14 = vld [vmem:[#allocation3 + $0x1a8] sm:$0xff] }
  0x5a   :  { %3431 = vmatpush3.msra.mxu0 %v364_v15  ;;  %3902 = vmatprep.subr.mxu1 %v364_v15 }
  0x5b   :  { %3432 = vmatprep.subr.mxu0 %v363_v16  ;;  %3918 = vmatpush3.msra.mxu1 %v364_v15  ;;  %v318_v15 = vld [vmem:[#allocation3 + $0x698] sm:$0xff] }
  0x5c   :  { %3433 = vmatpush3.msra.mxu0 %v363_v16  ;;  %3903 = vmatprep.subr.mxu1 %v363_v16 }
  0x5d   :  { %3435 = vmatmul.mubr.f32.vlgmr.msra.gmra.mxu0 %v108_v17  ;;  %3919 = vmatpush3.msra.mxu1 %v363_v16  ;;  %v161_v16 = vld [vmem:[#allocation3 + $0x1b0] sm:$0xff]  ;;  %v319_v17 = vld [vmem:[#allocation3 + $0x6a0] sm:$0xff] }
  0x5e   :  { %3437 = vmatprep.mubr.f32.mxu0 %v109_v18  ;;  %3737 = vmatprep.mubr.f32.mxu1 %v309_v61  ;;  %v162_v18 = vld [vmem:[#allocation3 + $0x1b8] sm:$0xff]  ;;  %v341_v61 = vld [vmem:[#allocation3 + $0x750] sm:$0xff] }
  0x5f   :  { %3738 = vmatmul.mubr.f32.vlgmr.msra.gmra.mxu1 %v310_v63  ;;  %v342_v63 = vld [vmem:[#allocation3 + $0x758] sm:$0xff] }
  0x60   :  { %3740 = vmatprep.mubr.f32.mxu1 %v311_v1  ;;  %v343_v1 = vld [vmem:[#allocation3 + $0x760] sm:$0xff] }
  0x61   :  { %3438 = vmatmul.mubr.f32.gmra.mxu0 %v110_v19  ;;  %v320_v19 = vld [vmem:[#allocation3 + $0x6a8] sm:$0xff] }
  0x62   :  { %3440 = vmatprep.mubr.f32.mxu0 %v111_v20  ;;  %v163_v20 = vld [vmem:[#allocation3 + $0x1c0] sm:$0xff] }
  0x63   :  { %3741 = vmatmul.mubr.f32.gmra.mxu1 %v312_v3  ;;  %v344_v3 = vld [vmem:[#allocation3 + $0x768] sm:$0xff] }
  0x64   :  { %3743 = vmatprep.mubr.f32.mxu1 %v313_v5  ;;  %v345_v5 = vld [vmem:[#allocation3 + $0x770] sm:$0xff] }
  0x65   :  { %3441 = vmatmul.mubr.f32.gmra.mxu0 %v112_v21  ;;  %v321_v21 = vld [vmem:[#allocation3 + $0x6b0] sm:$0xff] }
  0x66   :  { %3443 = vmatprep.mubr.f32.mxu0 %v113_v22  ;;  %v164_v22 = vld [vmem:[#allocation3 + $0x1c8] sm:$0xff] }
  0x67   :  { %3744 = vmatmul.mubr.f32.gmra.mxu1 %v314_v7  ;;  %v346_v7 = vld [vmem:[#allocation3 + $0x778] sm:$0xff] }
  0x68   :  { %3746 = vmatprep.mubr.f32.mxu1 %v315_v9  ;;  %v347_v9 = vld [vmem:[#allocation3 + $0x780] sm:$0xff] }
  0x69   :  { %3444 = vmatmul.mubr.f32.gmra.mxu0 %v114_v23  ;;  %v322_v23 = vld [vmem:[#allocation3 + $0x6b8] sm:$0xff] }
  0x6a   :  { %3446 = vmatprep.mubr.f32.mxu0 %v115_v24  ;;  %v165_v24 = vld [vmem:[#allocation3 + $0x1d0] sm:$0xff] }
  0x6b   :  { %3747 = vmatmul.mubr.f32.gmra.mxu1 %v316_v11  ;;  %v348_v11 = vld [vmem:[#allocation3 + $0x788] sm:$0xff] }
  0x6c   :  { %3749 = vmatprep.mubr.f32.mxu1 %v317_v13  ;;  %v349_v13 = vld [vmem:[#allocation3 + $0x790] sm:$0xff] }
  0x6d   :  { %3447 = vmatmul.mubr.f32.gmra.mxu0 %v116_v25  ;;  %v323_v25 = vld [vmem:[#allocation3 + $0x6c0] sm:$0xff] }
  0x6e   :  { %3449 = vmatprep.mubr.f32.mxu0 %v117_v26  ;;  %v166_v26 = vld [vmem:[#allocation3 + $0x1d8] sm:$0xff] }
  0x6f   :  { %3750 = vmatmul.mubr.f32.gmra.mxu1 %v318_v15  ;;  %v350_v15 = vld [vmem:[#allocation3 + $0x798] sm:$0xff] }
  0x70   :  { %3752 = vmatprep.mubr.f32.mxu1 %v319_v17  ;;  %v351_v17 = vld [vmem:[#allocation3 + $0x7a0] sm:$0xff] }
  0x71   :  { %3450 = vmatmul.mubr.f32.gmra.mxu0 %v118_v27  ;;  %v324_v27 = vld [vmem:[#allocation3 + $0x6c8] sm:$0xff] }
  0x72   :  { %3452 = vmatprep.mubr.f32.mxu0 %v119_v28  ;;  %v167_v28 = vld [vmem:[#allocation3 + $0x1e0] sm:$0xff] }
  0x73   :  { %3753 = vmatmul.mubr.f32.gmra.mxu1 %v320_v19  ;;  %v352_v19 = vld [vmem:[#allocation3 + $0x7a8] sm:$0xff] }
  0x74   :  { %3755 = vmatprep.mubr.f32.mxu1 %v321_v21  ;;  %v353_v21 = vld [vmem:[#allocation3 + $0x7b0] sm:$0xff] }
  0x75   :  { %3453 = vmatmul.mubr.f32.gmra.mxu0 %v120_v29  ;;  %v325_v29 = vld [vmem:[#allocation3 + $0x6d0] sm:$0xff] }
  0x76   :  { %3455 = vmatprep.mubr.f32.mxu0 %v121_v30  ;;  %v168_v30 = vld [vmem:[#allocation3 + $0x1e8] sm:$0xff] }
  0x77   :  { %3756 = vmatmul.mubr.f32.gmra.mxu1 %v322_v23  ;;  %v354_v23 = vld [vmem:[#allocation3 + $0x7b8] sm:$0xff] }
  0x78   :  { %3758 = vmatprep.mubr.f32.mxu1 %v323_v25  ;;  %v355_v25 = vld [vmem:[#allocation3 + $0x7c0] sm:$0xff] }
  0x79   :  { %3456 = vmatmul.mubr.f32.gmra.mxu0 %v122_v31  ;;  %v326_v31 = vld [vmem:[#allocation3 + $0x6d8] sm:$0xff] }
  0x7a   :  { %3458 = vmatprep.mubr.f32.mxu0 %v123_v32  ;;  %v169_v32 = vld [vmem:[#allocation3 + $0x1f0] sm:$0xff] }
  0x7b   :  { %3759 = vmatmul.mubr.f32.gmra.mxu1 %v324_v27  ;;  %v356_v27 = vld [vmem:[#allocation3 + $0x7c8] sm:$0xff] }
  0x7c   :  { %3761 = vmatprep.mubr.f32.mxu1 %v325_v29  ;;  %v357_v29 = vld [vmem:[#allocation3 + $0x7d0] sm:$0xff] }
  0x7d   :  { %3459 = vmatmul.mubr.f32.gmra.mxu0 %v124_v33  ;;  %v327_v33 = vld [vmem:[#allocation3 + $0x6e0] sm:$0xff] }
  0x7e   :  { %3461 = vmatprep.mubr.f32.mxu0 %v125_v34  ;;  %v170_v34 = vld [vmem:[#allocation3 + $0x1f8] sm:$0xff] }
  0x7f   :  { %3762 = vmatmul.mubr.f32.gmra.mxu1 %v326_v31  ;;  %v358_v31 = vld [vmem:[#allocation3 + $0x7d8] sm:$0xff] }
  0x80   :  { %3764 = vmatprep.mubr.f32.mxu1 %v327_v33  ;;  %v359_v33 = vld [vmem:[#allocation3 + $0x7e0] sm:$0xff] }
  0x81   :  { %3462 = vmatmul.mubr.f32.gmra.mxu0 %v126_v35  ;;  %v328_v35 = vld [vmem:[#allocation3 + $0x6e8] sm:$0xff] }
  0x82   :  { %3464 = vmatprep.mubr.f32.mxu0 %v127_v36  ;;  %v171_v36 = vld [vmem:[#allocation3 + $0x200] sm:$0xff] }
  0x83   :  { %3765 = vmatmul.mubr.f32.gmra.mxu1 %v328_v35  ;;  %v360_v35 = vld [vmem:[#allocation3 + $0x7e8] sm:$0xff] }
  0x85   :  { %3465 = vmatmul.mubr.f32.gmra.mxu0 %v128_v37  ;;  %v329_v37 = vld [vmem:[#allocation3 + $0x6f0] sm:$0xff] }
  0x86   :  { %3467 = vmatprep.mubr.f32.mxu0 %v129_v38  ;;  %v172_v38 = vld [vmem:[#allocation3 + $0x208] sm:$0xff]  ;;  %3767 = vmatprep.mubr.f32.mxu1 %v329_v37  ;;  %v361_v37 = vld [vmem:[#allocation3 + $0x7f0] sm:$0xff] }
  0x89   :  { %3468 = vmatmul.mubr.f32.gmra.mxu0 %v130_v39  ;;  %v330_v39 = vld [vmem:[#allocation3 + $0x6f8] sm:$0xff] }
  0x8a   :  { %3470 = vmatprep.mubr.f32.mxu0 %v131_v40  ;;  %v173_v40 = vld [vmem:[#allocation3 + $0x210] sm:$0xff]  ;;  %3768 = vmatmul.mubr.f32.gmra.mxu1 %v330_v39  ;;  %v362_v39 = vld [vmem:[#allocation3 + $0x7f8] sm:$0xff] }
  0x8d   :  { %3471 = vmatmul.mubr.f32.gmra.mxu0 %v132_v41  ;;  %v331_v41 = vld [vmem:[#allocation3 + $0x700] sm:$0xff] }
  0x8e   :  { %3473 = vmatprep.mubr.f32.mxu0 %v133_v42  ;;  %v174_v42 = vld [vmem:[#allocation3 + $0x218] sm:$0xff]  ;;  %3770 = vmatprep.mubr.f32.mxu1 %v331_v41 }
  0x91   :  { %3474 = vmatmul.mubr.f32.gmra.mxu0 %v134_v43  ;;  %v332_v43 = vld [vmem:[#allocation3 + $0x708] sm:$0xff] }
  0x92   :  { %3476 = vmatprep.mubr.f32.mxu0 %v135_v44  ;;  %v175_v44 = vld [vmem:[#allocation3 + $0x220] sm:$0xff]  ;;  %3771 = vmatmul.mubr.f32.gmra.mxu1 %v332_v43  ;;  %v206_v43 = vld [vmem:[#allocation3 + $0x318] sm:$0xff] }
  0x95   :  { %3477 = vmatmul.mubr.f32.gmra.mxu0 %v136_v45  ;;  %v333_v45 = vld [vmem:[#allocation3 + $0x710] sm:$0xff] }
  0x96   :  { %3479 = vmatprep.mubr.f32.mxu0 %v137_v46  ;;  %v176_v46 = vld [vmem:[#allocation3 + $0x228] sm:$0xff]  ;;  %3773 = vmatprep.mubr.f32.mxu1 %v333_v45  ;;  %v207_v45 = vld [vmem:[#allocation3 + $0x320] sm:$0xff] }
  0x99   :  { %3480 = vmatmul.mubr.f32.gmra.mxu0 %v138_v47  ;;  %v334_v47 = vld [vmem:[#allocation3 + $0x718] sm:$0xff] }
  0x9a   :  { %3482 = vmatprep.mubr.f32.mxu0 %v139_v48  ;;  %v177_v48 = vld [vmem:[#allocation3 + $0x230] sm:$0xff]  ;;  %3774 = vmatmul.mubr.f32.gmra.mxu1 %v334_v47  ;;  %v208_v47 = vld [vmem:[#allocation3 + $0x328] sm:$0xff] }
  0x9d   :  { %3483 = vmatmul.mubr.f32.gmra.mxu0 %v140_v49  ;;  %v335_v49 = vld [vmem:[#allocation3 + $0x720] sm:$0xff] }
  0x9e   :  { %3485 = vmatprep.mubr.f32.mxu0 %v141_v50  ;;  %v178_v50 = vld [vmem:[#allocation3 + $0x238] sm:$0xff]  ;;  %3776 = vmatprep.mubr.f32.mxu1 %v335_v49  ;;  %v209_v49 = vld [vmem:[#allocation3 + $0x330] sm:$0xff] }
  0xa1   :  { %3486 = vmatmul.mubr.f32.gmra.mxu0 %v142_v51  ;;  %v336_v51 = vld [vmem:[#allocation3 + $0x728] sm:$0xff] }
  0xa2   :  { %3488 = vmatprep.mubr.f32.mxu0 %v143_v52  ;;  %v179_v52 = vld [vmem:[#allocation3 + $0x240] sm:$0xff]  ;;  %3777 = vmatmul.mubr.f32.gmra.mxu1 %v336_v51  ;;  %v210_v51 = vld [vmem:[#allocation3 + $0x338] sm:$0xff] }
  0xa5   :  { %3489 = vmatmul.mubr.f32.gmra.mxu0 %v144_v53  ;;  %v337_v53 = vld [vmem:[#allocation3 + $0x730] sm:$0xff] }
  0xa6   :  { %3491 = vmatprep.mubr.f32.mxu0 %v145_v54  ;;  %v180_v54 = vld [vmem:[#allocation3 + $0x248] sm:$0xff]  ;;  %3779 = vmatprep.mubr.f32.mxu1 %v337_v53  ;;  %v211_v53 = vld [vmem:[#allocation3 + $0x340] sm:$0xff] }
  0xa9   :  { %3492 = vmatmul.mubr.f32.gmra.mxu0 %v146_v55  ;;  %v338_v55 = vld [vmem:[#allocation3 + $0x738] sm:$0xff] }
  0xaa   :  { %3494 = vmatprep.mubr.f32.mxu0 %v147_v56  ;;  %v181_v56 = vld [vmem:[#allocation3 + $0x250] sm:$0xff]  ;;  %3780 = vmatmul.mubr.f32.gmra.mxu1 %v338_v55  ;;  %v212_v55 = vld [vmem:[#allocation3 + $0x348] sm:$0xff] }
  0xad   :  { %3495 = vmatmul.mubr.f32.gmra.mxu0 %v148_v57  ;;  %v339_v57 = vld [vmem:[#allocation3 + $0x740] sm:$0xff] }
  0xae   :  { %3497 = vmatprep.mubr.f32.mxu0 %v149_v58  ;;  %v182_v58 = vld [vmem:[#allocation3 + $0x258] sm:$0xff]  ;;  %3782 = vmatprep.mubr.f32.mxu1 %v339_v57  ;;  %v213_v57 = vld [vmem:[#allocation3 + $0x350] sm:$0xff] }
  0xb1   :  { %3498 = vmatmul.mubr.f32.gmra.mxu0 %v150_v59  ;;  %v340_v59 = vld [vmem:[#allocation3 + $0x748] sm:$0xff] }
  0xb2   :  { %3500 = vmatprep.mubr.f32.mxu0 %v151_v60  ;;  %v183_v60 = vld [vmem:[#allocation3 + $0x260] sm:$0xff]  ;;  %3783 = vmatmul.mubr.f32.gmra.mxu1 %v340_v59  ;;  %v214_v59 = vld [vmem:[#allocation3 + $0x358] sm:$0xff] }
  0xb3   :  { %3785 = vmatprep.mubr.f32.mxu1 %v341_v61  ;;  %v215_v61 = vld [vmem:[#allocation3 + $0x360] sm:$0xff] }
  0xb5   :  { %3501 = vmatmul.mubr.f32.gmra.mxu0 %v152_v62  ;;  %v184_v62 = vld [vmem:[#allocation3 + $0x268] sm:$0xff] }
  0xb6   :  { %3503 = vmatprep.mubr.f32.mxu0 %v153_v0  ;;  %v185_v0 = vld [vmem:[#allocation3 + $0x270] sm:$0xff]  ;;  %3786 = vmatmul.mubr.f32.gmra.mxu1 %v342_v63  ;;  %v216_v63 = vld [vmem:[#allocation3 + $0x368] sm:$0xff] }
  0xb7   :  { %3788 = vmatprep.mubr.f32.mxu1 %v343_v1  ;;  %v217_v1 = vld [vmem:[#allocation3 + $0x370] sm:$0xff] }
  0xb9   :  { %3504 = vmatmul.mubr.f32.gmra.mxu0 %v154_v2  ;;  %v186_v2 = vld [vmem:[#allocation3 + $0x278] sm:$0xff] }
  0xba   :  { %3506 = vmatprep.mubr.f32.mxu0 %v155_v4  ;;  %v187_v4 = vld [vmem:[#allocation3 + $0x280] sm:$0xff]  ;;  %3789 = vmatmul.mubr.f32.gmra.mxu1 %v344_v3  ;;  %v218_v3 = vld [vmem:[#allocation3 + $0x378] sm:$0xff] }
  0xbb   :  { %3791 = vmatprep.mubr.f32.mxu1 %v345_v5  ;;  %v219_v5 = vld [vmem:[#allocation3 + $0x380] sm:$0xff] }
  0xbd   :  { %3507 = vmatmul.mubr.f32.gmra.mxu0 %v156_v6  ;;  %v188_v6 = vld [vmem:[#allocation3 + $0x288] sm:$0xff] }
  0xbe   :  { %3509 = vmatprep.mubr.f32.mxu0 %v157_v8  ;;  %v189_v8 = vld [vmem:[#allocation3 + $0x290] sm:$0xff]  ;;  %3792 = vmatmul.mubr.f32.gmra.mxu1 %v346_v7  ;;  %v220_v7 = vld [vmem:[#allocation3 + $0x388] sm:$0xff] }
  0xbf   :  { %3794 = vmatprep.mubr.f32.mxu1 %v347_v9  ;;  %v221_v9 = vld [vmem:[#allocation3 + $0x390] sm:$0xff] }
  0xc1   :  { %3510 = vmatmul.mubr.f32.gmra.mxu0 %v158_v10  ;;  %v190_v10 = vld [vmem:[#allocation3 + $0x298] sm:$0xff] }
  0xc2   :  { %3512 = vmatprep.mubr.f32.mxu0 %v159_v12  ;;  %v191_v12 = vld [vmem:[#allocation3 + $0x2a0] sm:$0xff]  ;;  %3795 = vmatmul.mubr.f32.gmra.mxu1 %v348_v11  ;;  %v222_v11 = vld [vmem:[#allocation3 + $0x398] sm:$0xff] }
  0xc3   :  { %3797 = vmatprep.mubr.f32.mxu1 %v349_v13  ;;  %v223_v13 = vld [vmem:[#allocation3 + $0x3a0] sm:$0xff] }
  0xc5   :  { %3513 = vmatmul.mubr.f32.gmra.mxu0 %v160_v14  ;;  %v192_v14 = vld [vmem:[#allocation3 + $0x2a8] sm:$0xff] }
  0xc6   :  { %3515 = vmatprep.mubr.f32.mxu0 %v161_v16  ;;  %v193_v16 = vld [vmem:[#allocation3 + $0x2b0] sm:$0xff]  ;;  %3798 = vmatmul.mubr.f32.gmra.mxu1 %v350_v15  ;;  %v224_v15 = vld [vmem:[#allocation3 + $0x3a8] sm:$0xff] }
  0xc7   :  { %3800 = vmatprep.mubr.f32.mxu1 %v351_v17  ;;  %v225_v17 = vld [vmem:[#allocation3 + $0x3b0] sm:$0xff] }
  0xc9   :  { %3516 = vmatmul.mubr.f32.gmra.mxu0 %v162_v18  ;;  %v194_v18 = vld [vmem:[#allocation3 + $0x2b8] sm:$0xff] }
  0xca   :  { %3518 = vmatprep.mubr.f32.mxu0 %v163_v20  ;;  %v195_v20 = vld [vmem:[#allocation3 + $0x2c0] sm:$0xff]  ;;  %3801 = vmatmul.mubr.f32.gmra.mxu1 %v352_v19  ;;  %v226_v19 = vld [vmem:[#allocation3 + $0x3b8] sm:$0xff] }
  0xcb   :  { %3803 = vmatprep.mubr.f32.mxu1 %v353_v21  ;;  %v227_v21 = vld [vmem:[#allocation3 + $0x3c0] sm:$0xff] }
  0xcd   :  { %3519 = vmatmul.mubr.f32.gmra.mxu0 %v164_v22  ;;  %v196_v22 = vld [vmem:[#allocation3 + $0x2c8] sm:$0xff] }
  0xce   :  { %3521 = vmatprep.mubr.f32.mxu0 %v165_v24  ;;  %v197_v24 = vld [vmem:[#allocation3 + $0x2d0] sm:$0xff]  ;;  %3804 = vmatmul.mubr.f32.gmra.mxu1 %v354_v23  ;;  %v228_v23 = vld [vmem:[#allocation3 + $0x3c8] sm:$0xff] }
  0xcf   :  { %3806 = vmatprep.mubr.f32.mxu1 %v355_v25  ;;  %v229_v25 = vld [vmem:[#allocation3 + $0x3d0] sm:$0xff] }
  0xd1   :  { %3522 = vmatmul.mubr.f32.gmra.mxu0 %v166_v26  ;;  %v198_v26 = vld [vmem:[#allocation3 + $0x2d8] sm:$0xff] }
  0xd2   :  { %3524 = vmatprep.mubr.f32.mxu0 %v167_v28  ;;  %v199_v28 = vld [vmem:[#allocation3 + $0x2e0] sm:$0xff]  ;;  %3807 = vmatmul.mubr.f32.gmra.mxu1 %v356_v27  ;;  %v230_v27 = vld [vmem:[#allocation3 + $0x3d8] sm:$0xff] }
  0xd3   :  { %3809 = vmatprep.mubr.f32.mxu1 %v357_v29  ;;  %v231_v29 = vld [vmem:[#allocation3 + $0x3e0] sm:$0xff] }
  0xd5   :  { %3525 = vmatmul.mubr.f32.gmra.mxu0 %v168_v30  ;;  %v200_v30 = vld [vmem:[#allocation3 + $0x2e8] sm:$0xff] }
  0xd6   :  { %3527 = vmatprep.mubr.f32.mxu0 %v169_v32  ;;  %v201_v32 = vld [vmem:[#allocation3 + $0x2f0] sm:$0xff]  ;;  %3810 = vmatmul.mubr.f32.gmra.mxu1 %v358_v31  ;;  %v232_v31 = vld [vmem:[#allocation3 + $0x3e8] sm:$0xff] }
  0xd7   :  { %3812 = vmatprep.mubr.f32.mxu1 %v359_v33  ;;  %v233_v33 = vld [vmem:[#allocation3 + $0x3f0] sm:$0xff] }
  0xd9   :  { %3528 = vmatmul.mubr.f32.gmra.mxu0 %v170_v34  ;;  %v202_v34 = vld [vmem:[#allocation3 + $0x2f8] sm:$0xff] }
  0xda   :  { %3530 = vmatprep.mubr.f32.mxu0 %v171_v36  ;;  %v203_v36 = vld [vmem:[#allocation3 + $0x300] sm:$0xff]  ;;  %3813 = vmatmul.mubr.f32.gmra.mxu1 %v360_v35  ;;  %v234_v35 = vld [vmem:[#allocation3 + $0x3f8] sm:$0xff] }
  0xdb   :  { %3815 = vmatprep.mubr.f32.mxu1 %v361_v37  ;;  %v235_v37 = vld [vmem:[#allocation3 + $0x400] sm:$0xff] }
  0xdd   :  { %3531 = vmatmul.mubr.f32.gmra.mxu0 %v172_v38  ;;  %v204_v38 = vld [vmem:[#allocation3 + $0x308] sm:$0xff] }
  0xde   :  { %3533 = vmatprep.mubr.f32.mxu0 %v173_v40  ;;  %v205_v40 = vld [vmem:[#allocation3 + $0x310] sm:$0xff]  ;;  %3816 = vmatmul.mubr.f32.gmra.mxu1 %v362_v39 }
  0xe1   :  { %3534 = vmatmul.mubr.f32.gmra.mxu0 %v174_v42  ;;  %v1989_v42 = vld [vmem:[#allocation6 + $0x8] sm:$0xff] }
  0xe2   :  { %3536 = vmatprep.mubr.f32.mxu0 %v175_v44  ;;  %2068 = vmatprep.mubr.f32.mxu1 %v1989_v42 }
  0xe5   :  { %3537 = vmatmul.mubr.f32.gmra.mxu0 %v176_v46 }
  0xe6   :  { %3539 = vmatprep.mubr.f32.mxu0 %v177_v48 }
  0xe9   :  { %3540 = vmatmul.mubr.f32.gmra.mxu0 %v178_v50 }
  0xea   :  { %3542 = vmatprep.mubr.f32.mxu0 %v179_v52 }
  0xed   :  { %3543 = vmatmul.mubr.f32.gmra.mxu0 %v180_v54 }
  0xee   :  { %3545 = vmatprep.mubr.f32.mxu0 %v181_v56 }
  0xf1   :  { %3546 = vmatmul.mubr.f32.gmra.mxu0 %v182_v58 }
  0xf2   :  { %3548 = vmatprep.mubr.f32.mxu0 %v183_v60 }
  0xf5   :  { %3549 = vmatmul.mubr.f32.gmra.mxu0 %v184_v62 }
  0xf6   :  { %3551 = vmatprep.mubr.f32.mxu0 %v185_v0 }
  0xf9   :  { %3552 = vmatmul.mubr.f32.gmra.mxu0 %v186_v2 }
  0xfa   :  { %3554 = vmatprep.mubr.f32.mxu0 %v187_v4 }
  0xfd   :  { %3555 = vmatmul.mubr.f32.gmra.mxu0 %v188_v6 }
  0xfe   :  { %3557 = vmatprep.mubr.f32.mxu0 %v189_v8 }
 0x101   :  { %3558 = vmatmul.mubr.f32.gmra.mxu0 %v190_v10 }
 0x102   :  { %3560 = vmatprep.mubr.f32.mxu0 %v191_v12 }
 0x105   :  { %3561 = vmatmul.mubr.f32.gmra.mxu0 %v192_v14 }
 0x106   :  { %3563 = vmatprep.mubr.f32.mxu0 %v193_v16 }
 0x109   :  { %3564 = vmatmul.mubr.f32.gmra.mxu0 %v194_v18 }
 0x10a   :  { %3566 = vmatprep.mubr.f32.mxu0 %v195_v20 }
 0x10d   :  { %3567 = vmatmul.mubr.f32.gmra.mxu0 %v196_v22 }
 0x10e   :  { %3569 = vmatprep.mubr.f32.mxu0 %v197_v24 }
 0x111   :  { %3570 = vmatmul.mubr.f32.gmra.mxu0 %v198_v26 }
 0x112   :  { %3572 = vmatprep.mubr.f32.mxu0 %v199_v28 }
 0x115   :  { %3573 = vmatmul.mubr.f32.gmra.mxu0 %v200_v30 }
 0x116   :  { %3575 = vmatprep.mubr.f32.mxu0 %v201_v32 }
 0x119   :  { %3576 = vmatmul.mubr.f32.gmra.mxu0 %v202_v34 }
 0x11a   :  { %3578 = vmatprep.mubr.f32.mxu0 %v203_v36 }
 0x11d   :  { %v4154_v41 = vpop.f32.mrf.mxu0  ;;  %3579 = vmatmul.mubr.f32.gmra.mxu0 %v204_v38  ;;  %v4205_v38 = vld [vmem:[%s5031_s3] ss:$0 sm:$0xff] }
 0x11e   :  { %3581 = vmatprep.mubr.f32.mxu0 %v205_v40 }
 0x11f   :  { %v4156_v44 = vpop.f32.mrf.mxu0 }
 0x121   :  { %v4158_v46 = vpop.f32.mrf.mxu0  ;;  %3582 = vmatmul.mubr.f32.gmra.mxu0 %v206_v43  ;;  %v236_v43 = vld [vmem:[#allocation3 + $0x408] sm:$0xff] }
 0x122   :  { %3584 = vmatprep.mubr.f32.mxu0 %v207_v45 }
 0x123   :  { %v4160_v48 = vpop.f32.mrf.mxu0 }
 0x125   :  { %v4162_v50 = vpop.f32.mrf.mxu0  ;;  %3585 = vmatmul.mubr.f32.gmra.mxu0 %v208_v47 }
 0x126   :  { %3587 = vmatprep.mubr.f32.mxu0 %v209_v49  ;;  %v237_v49 = vld [vmem:[#allocation3 + $0x410] sm:$0xff] }
 0x127   :  { %v4164_v52 = vpop.f32.mrf.mxu0 }
 0x129   :  { %v4166_v54 = vpop.f32.mrf.mxu0  ;;  %3588 = vmatmul.mubr.f32.gmra.mxu0 %v210_v51 }
 0x12a   :  { %3590 = vmatprep.mubr.f32.mxu0 %v211_v53 }
 0x12b   :  { %v4168_v56 = vpop.f32.mrf.mxu0 }
 0x12d   :  { %v4170_v58 = vpop.f32.mrf.mxu0  ;;  %3591 = vmatmul.mubr.f32.gmra.mxu0 %v212_v55 }
 0x12e   :  { %3593 = vmatprep.mubr.f32.mxu0 %v213_v57 }
 0x12f   :  { %v4172_v60 = vpop.f32.mrf.mxu0 }
 0x131   :  { %v4174_v62 = vpop.f32.mrf.mxu0  ;;  %3594 = vmatmul.mubr.f32.gmra.mxu0 %v214_v59 }
 0x132   :  { %3596 = vmatprep.mubr.f32.mxu0 %v215_v61 }
 0x133   :  { %v4176_v0 = vpop.f32.mrf.mxu0 }
 0x135   :  { %v4178_v2 = vpop.f32.mrf.mxu0  ;;  %3597 = vmatmul.mubr.f32.gmra.mxu0 %v216_v63 }
 0x136   :  { %3599 = vmatprep.mubr.f32.mxu0 %v217_v1  ;;  %v518_v57 = vadd.f32 %v4178_v2, %v4205_v38 }
 0x137   :  { %v4180_v4 = vpop.f32.mrf.mxu0 }
 0x139   :  { %v3457_v6 = vpop.f32.mrf.mxu0  ;;  %3600 = vmatmul.mubr.f32.gmra.mxu0 %v218_v3  ;;  %v238_v3 = vld [vmem:[#allocation3 + $0x418] sm:$0xff] }
 0x13a   :  { %3602 = vmatprep.mubr.f32.mxu0 %v219_v5  ;;  %v528_v39 = vadd.f32 %v3457_v6, %v4205_v38  ;;  %v513_v5 = vadd.f32 %v4205_v38, %v4180_v4 }
 0x13b   :  { %v522_v8 = vpop.f32.mrf.mxu0 }
 0x13c   :  { %v523_v45 = vadd.f32 %v4205_v38, %v522_v8  ;;  %v1746_v59 = vmax.f32 %v528_v39, 0.0  ;;  %v239_v8 = vld [vmem:[#allocation3 + $0x420] sm:$0xff] }
 0x13d   :  { %v4182_v10 = vpop.f32.mrf.mxu0  ;;  %3603 = vmatmul.mubr.f32.gmra.mxu0 %v220_v7 }
 0x13e   :  { %3605 = vmatprep.mubr.f32.mxu0 %v221_v9  ;;  %v1745_v6 = vmax.f32 %v523_v45, 0.0  ;;  %v244_v45 = vld [vmem:[#allocation3 + $0x448] sm:$0xff] }
 0x13f   :  { %v4184_v12 = vpop.f32.mrf.mxu0 }
 0x141   :  { %v4186_v14 = vpop.f32.mrf.mxu0  ;;  %3606 = vmatmul.mubr.f32.gmra.mxu0 %v222_v11  ;;  %v508_v11 = vadd.f32 %v4174_v62, %v4205_v38 }
 0x142   :  { %3608 = vmatprep.mubr.f32.mxu0 %v223_v13  ;;  %v1744_v13 = vmax.f32 %v518_v57, 0.0 }
 0x143   :  { %v4188_v16 = vpop.f32.mrf.mxu0 }
 0x145   :  { %v4190_v18 = vpop.f32.mrf.mxu0  ;;  %3609 = vmatmul.mubr.f32.gmra.mxu0 %v224_v15 }
 0x146   :  { %3611 = vmatprep.mubr.f32.mxu0 %v225_v17 }
 0x147   :  { %v4192_v20 = vpop.f32.mrf.mxu0 }
 0x149   :  { %v4194_v22 = vpop.f32.mrf.mxu0  ;;  %3612 = vmatmul.mubr.f32.gmra.mxu0 %v226_v19  ;;  %v240_v19 = vld [vmem:[#allocation3 + $0x428] sm:$0xff] }
 0x14a   :  { %3614 = vmatprep.mubr.f32.mxu0 %v227_v21  ;;  %v503_v21 = vadd.f32 %v4205_v38, %v4176_v0 }
 0x14b   :  { %v4196_v24 = vpop.f32.mrf.mxu0 }
 0x14d   :  { %v4198_v26 = vpop.f32.mrf.mxu0  ;;  %3615 = vmatmul.mubr.f32.gmra.mxu0 %v228_v23  ;;  %v1743_v23 = vmax.f32 %v513_v5, 0.0  ;;  %v548_v5 = vadd.f32 %v4186_v14, %v4205_v38  ;;  %v463_v14 = vadd.f32 %v4205_v38, %v4160_v48  ;;  %v533_v48 = vadd.f32 %v4205_v38, %v4184_v12  ;;  %v252_v12 = vld [vmem:[#allocation3 + $0x488] sm:$0xff] }
 0x14e   :  { %3617 = vmatprep.mubr.f32.mxu0 %v229_v25  ;;  %v578_v62 = vadd.f32 %v4198_v26, %v4205_v38  ;;  %v493_v26 = vadd.f32 %v4205_v38, %v4172_v60  ;;  %v563_v60 = vadd.f32 %v4205_v38, %v4196_v24  ;;  %v478_v24 = vadd.f32 %v4162_v50, %v4205_v38  ;;  %v247_v50 = vld [vmem:[#allocation3 + $0x460] sm:$0xff] }
 0x14f   :  { %v4200_v28 = vpop.f32.mrf.mxu0 }
 0x150   :  { %v573_v0 = vadd.f32 %v4205_v38, %v4200_v28  ;;  %v1756_v39 = vmax.f32 %v578_v62, 0.0  ;;  %v488_v28 = vadd.f32 %v4166_v54, %v4205_v38  ;;  %v245_v54 = vld [vmem:[#allocation3 + $0x450] sm:$0xff]  ;;  %v250_v62 = vld [vmem:[#allocation3 + $0x478] sm:$0xff] }
 0x151   :  { %v3475_v30 = vpop.f32.mrf.mxu0  ;;  %3618 = vmatmul.mubr.f32.gmra.mxu0 %v230_v27  ;;  %v241_v27 = vld [vmem:[#allocation3 + $0x430] sm:$0xff] }
 0x152   :  { %3620 = vmatprep.mubr.f32.mxu0 %v231_v29  ;;  %v588_v2 = vadd.f32 %v3475_v30, %v4205_v38  ;;  %v498_v30 = vadd.f32 %v4170_v58, %v4205_v38  ;;  %v243_v58 = vld [vmem:[#allocation3 + $0x440] sm:$0xff] }
 0x153   :  { %v582_v32 = vpop.f32.mrf.mxu0 }
 0x154   :  { %v583_v17 = vadd.f32 %v4205_v38, %v582_v32  ;;  %v1758_v29 = vmax.f32 %v588_v2, 0.0 }
 0x155   :  { %v3478_v34 = vpop.f32.mrf.mxu0  ;;  %3621 = vmatmul.mubr.f32.gmra.mxu0 %v232_v31  ;;  %v1742_v31 = vmax.f32 %v508_v11, 0.0  ;;  %v248_v11 = vld [vmem:[#allocation3 + $0x468] sm:$0xff] }
 0x156   :  { %3623 = vmatprep.mubr.f32.mxu0 %v233_v33  ;;  %v598_v51 = vadd.f32 %v3478_v34, %v4205_v38  ;;  %v1757_v33 = vmax.f32 %v583_v17, 0.0  ;;  %v242_v34 = vld [vmem:[#allocation3 + $0x438] sm:$0xff] }
 0x157   :  { %v592_v36 = vpop.f32.mrf.mxu0 }
 0x158   :  { %v593_v63 = vadd.f32 %v4205_v38, %v592_v36  ;;  %v1760_v9 = vmax.f32 %v598_v51, 0.0  ;;  %v558_v51 = vadd.f32 %v4190_v18, %v4205_v38  ;;  %v473_v18 = vadd.f32 %v4205_v38, %v4164_v52 }
 0x159   :  { %v3481_v40 = vpop.f32.mrf.mxu0  ;;  %3624 = vmatmul.mubr.f32.gmra.mxu0 %v234_v35  ;;  %v1741_v35 = vmax.f32 %v503_v21, 0.0  ;;  %v543_v52 = vadd.f32 %v4205_v38, %v4188_v16  ;;  %v458_v16 = vadd.f32 %v4154_v41, %v4205_v38  ;;  %v251_v41 = vld [vmem:[#allocation3 + $0x480] sm:$0xff] }
 0x15a   :  { %v608_v42 = vadd.f32 %v3481_v40, %v4205_v38  ;;  %3626 = vmatprep.mubr.f32.mxu0 %v235_v37  ;;  %v1759_v4 = vmax.f32 %v593_v63, 0.0  ;;  %v568_v37 = vadd.f32 %v4194_v22, %v4205_v38  ;;  %v1740_v40 = vmax.f32 %v498_v30, 0.0  ;;  %v246_v63 = vld [vmem:[#allocation3 + $0x458] sm:$0xff] }
 0x15b   :  { %v602_v47 = vpop.f32.mrf.mxu0  ;;  %v483_v22 = vadd.f32 %v4205_v38, %v4168_v56  ;;  %v553_v56 = vadd.f32 %v4205_v38, %v4192_v20  ;;  %v468_v20 = vadd.f32 %v4158_v46, %v4205_v38  ;;  %v249_v46 = vld [vmem:[#allocation3 + $0x470] sm:$0xff] }
 0x15c   :  { %v1762_v53 = vmax.f32 %v608_v42, 0.0  ;;  %v603_v55 = vadd.f32 %v4205_v38, %v602_v47  ;;  %v1739_v47 = vmax.f32 %v493_v26, 0.0 }
 0x15d   :  { %v4214_v61 = vpop.f32.mrf.mxu0  ;;  %3627 = vmatmul.mubr.f32.gmra.mxu0 %v236_v43  ;;  %v1755_v43 = vmax.f32 %v573_v0, 0.0  ;;  %v1734_v21 = vmax.f32 %v468_v20, 0.0  ;;  %v1732_v0 = vmax.f32 %v458_v16, 0.0  ;;  %v264_v20 = vld [vmem:[#allocation3 + $0x4e8] sm:$0xff] }
 0x15e   :  { %v1761_v1 = vmax.f32 %v603_v55, 0.0  ;;  %3088 = vmatprep.subr.mxu1 %v1762_v53  ;;  %3629 = vmatprep.mubr.f32.mxu0 %v237_v49  ;;  %v1754_v53 = vmax.f32 %v568_v37, 0.0  ;;  %v1738_v55 = vmax.f32 %v488_v28, 0.0  ;;  %v1991_v37 = vld [vmem:[#allocation6 + $0x18] sm:$0xff]  ;;  %v268_v16 = vld [vmem:[#allocation3 + $0x508] sm:$0xff] }
 0x15f   :  { %v4219_v7 = vpop.f32.mrf.mxu0  ;;  %3089 = vmatpush3.msra.mxu1 %v1746_v59  ;;  %v1753_v59 = vmax.f32 %v563_v60, 0.0  ;;  %v254_v28 = vld [vmem:[#allocation3 + $0x498] sm:$0xff]  ;;  %v255_v60 = vld [vmem:[#allocation3 + $0x4a0] sm:$0xff] }
 0x160   :  { %3090 = vmatprep.subr.mxu1 %v1761_v1  ;;  %v1737_v1 = vmax.f32 %v483_v22, 0.0 }
 0x161   :  { %v4224_v15 = vpop.f32.mrf.mxu0  ;;  %3630 = vmatmul.mubr.f32.gmra.mxu0 %v238_v3  ;;  %3091 = vmatpush3.msra.mxu1 %v1745_v6  ;;  %v1752_v6 = vmax.f32 %v558_v51, 0.0  ;;  %v258_v51 = vld [vmem:[#allocation3 + $0x4b8] sm:$0xff] }
 0x162   :  { %3092 = vmatprep.subr.mxu1 %v1760_v9  ;;  %3632 = vmatprep.mubr.f32.mxu0 %v239_v8  ;;  %v1736_v8 = vmax.f32 %v478_v24, 0.0  ;;  %v1751_v9 = vmax.f32 %v553_v56, 0.0  ;;  %v259_v24 = vld [vmem:[#allocation3 + $0x4c0] sm:$0xff]  ;;  %v260_v56 = vld [vmem:[#allocation3 + $0x4c8] sm:$0xff] }
 0x163   :  { %v4229_v25 = vpop.f32.mrf.mxu0  ;;  %3093 = vmatpush3.msra.mxu1 %v1744_v13  ;;  %v1735_v13 = vmax.f32 %v473_v18, 0.0 }
 0x164   :  { %3094 = vmatprep.subr.mxu1 %v1759_v4  ;;  %v538_v4 = vadd.f32 %v4182_v10, %v4205_v38  ;;  %v453_v10 = vadd.f32 %v4205_v38, %v4156_v44  ;;  %v1988_v44 = vld [vmem:[#allocation6] sm:$0xff] }
 0x165   :  { %v4235_v32 = vpop.f32.mrf.mxu0  ;;  %3633 = vmatmul.mubr.f32.gmra.mxu0 %v240_v19  ;;  %3095 = vmatpush3.msra.mxu1 %v1743_v23  ;;  %v1750_v19 = vmax.f32 %v548_v5, 0.0  ;;  %v263_v5 = vld [vmem:[#allocation3 + $0x4e0] sm:$0xff] }
 0x166   :  { %3096 = vmatprep.subr.mxu1 %v1758_v29  ;;  %3635 = vmatprep.mubr.f32.mxu0 %v241_v27  ;;  %v1749_v27 = vmax.f32 %v543_v52, 0.0  ;;  %v1733_v29 = vmax.f32 %v463_v14, 0.0  ;;  %v1731_v26 = vmax.f32 %v453_v10, 0.0  ;;  %v265_v52 = vld [vmem:[#allocation3 + $0x4f0] sm:$0xff] }
 0x167   :  { %v4241_v36 = vpop.f32.mrf.mxu0  ;;  %3097 = vmatpush3.msra.mxu1 %v1742_v31  ;;  %v1748_v31 = vmax.f32 %v538_v4, 0.0 }
 0x168   :  { %3098 = vmatprep.subr.mxu1 %v1757_v33 }
 0x169   :  { %v4247_v42 = vpop.f32.mrf.mxu0  ;;  %3636 = vmatmul.mubr.f32.gmra.mxu0 %v242_v34  ;;  %3099 = vmatpush3.msra.mxu1 %v1741_v35  ;;  %v1747_v34 = vmax.f32 %v533_v48, 0.0 }
 0x16a   :  { %3100 = vmatprep.subr.mxu1 %v1756_v39  ;;  %3638 = vmatprep.mubr.f32.mxu0 %v243_v58  ;;  %v253_v58 = vld [vmem:[#allocation3 + $0x490] sm:$0xff] }
 0x16b   :  { %v4253_v49 = vpop.f32.mrf.mxu0  ;;  %3101 = vmatpush3.msra.mxu1 %v1740_v40 }
 0x16c   :  { %3102 = vmatprep.subr.mxu1 %v1755_v43 }
 0x16d   :  { %v4259_v57 = vpop.f32.mrf.mxu0  ;;  %3639 = vmatmul.mubr.f32.gmra.mxu0 %v244_v45  ;;  %3103 = vmatpush3.msra.mxu1 %v1739_v47  ;;  %v256_v45 = vld [vmem:[#allocation3 + $0x4a8] sm:$0xff]  ;;  %v257_v47 = vld [vmem:[#allocation3 + $0x4b0] sm:$0xff] }
 0x16e   :  { %3104 = vmatprep.subr.mxu1 %v1754_v53  ;;  %3641 = vmatprep.mubr.f32.mxu0 %v245_v54 }
 0x16f   :  { %v4265_v3 = vpop.f32.mrf.mxu0  ;;  %3105 = vmatpush3.msra.mxu1 %v1738_v55 }
 0x170   :  { %3106 = vmatprep.subr.mxu1 %v1753_v59 }
 0x171   :  { %v4271_v2 = vpop.f32.mrf.mxu0  ;;  %3642 = vmatmul.mubr.f32.gmra.mxu0 %v246_v63  ;;  %3107 = vmatpush3.msra.mxu1 %v1737_v1  ;;  %v261_v63 = vld [vmem:[#allocation3 + $0x4d0] sm:$0xff]  ;;  %v262_v1 = vld [vmem:[#allocation3 + $0x4d8] sm:$0xff] }
 0x172   :  { %3108 = vmatprep.subr.mxu1 %v1752_v6  ;;  %3644 = vmatprep.mubr.f32.mxu0 %v247_v50 }
 0x173   :  { %v4277_v17 = vpop.f32.mrf.mxu0  ;;  %3109 = vmatpush3.msra.mxu1 %v1736_v8 }
 0x174   :  { %3110 = vmatprep.subr.mxu1 %v1751_v9 }
 0x175   :  { %v4283_v23 = vpop.f32.mrf.mxu0  ;;  %3645 = vmatmul.mubr.f32.gmra.mxu0 %v248_v11  ;;  %3111 = vmatpush3.msra.mxu1 %v1735_v13  ;;  %v266_v11 = vld [vmem:[#allocation3 + $0x4f8] sm:$0xff]  ;;  %v267_v13 = vld [vmem:[#allocation3 + $0x500] sm:$0xff] }
 0x176   :  { %3112 = vmatprep.subr.mxu1 %v1750_v19  ;;  %3647 = vmatprep.mubr.f32.mxu0 %v249_v46 }
 0x177   :  { %v4289_v30 = vpop.f32.mrf.mxu0  ;;  %3113 = vmatpush3.msra.mxu1 %v1734_v21 }
 0x178   :  { %3114 = vmatprep.subr.mxu1 %v1749_v27  ;;  %v269_v27 = vld [vmem:[#allocation3 + $0x510] sm:$0xff] }
 0x179   :  { %v3505_v33 = vpop.f32.mrf.mxu0  ;;  %3648 = vmatmul.mubr.f32.gmra.mxu0 %v250_v62  ;;  %3115 = vmatpush3.msra.mxu1 %v1733_v29 }
 0x17a   :  { %3116 = vmatprep.subr.mxu1 %v1748_v31  ;;  %3650 = vmatprep.mubr.f32.mxu0 %v251_v41  ;;  %v688_v46 = vadd.f32 %v3505_v33, %v4205_v38  ;;  %v678_v41 = vadd.f32 %v4283_v23, %v4205_v38 }
 0x17b   :  { %v682_v35 = vpop.f32.mrf.mxu0  ;;  %3117 = vmatpush3.msra.mxu1 %v1732_v0 }
 0x17c   :  { %3118 = vmatprep.subr.mxu1 %v1747_v34  ;;  %v683_v21 = vadd.f32 %v4205_v38, %v682_v35  ;;  %v1778_v31 = vmax.f32 %v688_v46, 0.0 }
 0x17d   :  { %v4291_v39 = vpop.f32.mrf.mxu0  ;;  %3651 = vmatmul.mubr.f32.gmra.mxu0 %v252_v12  ;;  %3119 = vmatpush3.msra.mxu1 %v1731_v26  ;;  %v270_v12 = vld [vmem:[#allocation3 + $0x518] sm:$0xff]  ;;  %v673_v26 = vadd.f32 %v4205_v38, %v4289_v30 }
 0x17e   :  { %3653 = vmatprep.mubr.f32.mxu0 %v253_v58  ;;  %2069 = vmatmul.mubr.f32.vlgmr.msra.gmra.mxu1 %v1988_v44  ;;  %v1777_v35 = vmax.f32 %v683_v21, 0.0  ;;  %v271_v44 = vld [vmem:[#allocation3 + $0x520] sm:$0xff]  ;;  %v276_v21 = vld [vmem:[#allocation3 + $0x548] sm:$0xff] }
 0x17f   :  { %v4293_v40 = vpop.f32.mrf.mxu0  ;;  %2138 = vmatprep.mubr.f32.mxu1 %v1991_v37 }
 0x181   :  { %v4295_v43 = vpop.f32.mrf.mxu0  ;;  %3654 = vmatmul.mubr.f32.gmra.mxu0 %v254_v28  ;;  %v668_v28 = vadd.f32 %v4271_v2, %v4205_v38 }
 0x182   :  { %3656 = vmatprep.mubr.f32.mxu0 %v255_v60  ;;  %v1776_v60 = vmax.f32 %v678_v41, 0.0 }
 0x183   :  { %v4297_v22 = vpop.f32.mrf.mxu0 }
 0x185   :  { %v4299_v54 = vpop.f32.mrf.mxu0  ;;  %3657 = vmatmul.mubr.f32.gmra.mxu0 %v256_v45 }
 0x186   :  { %3659 = vmatprep.mubr.f32.mxu0 %v257_v47 }
 0x187   :  { %v4301_v53 = vpop.f32.mrf.mxu0 }
 0x189   :  { %v4303_v55 = vpop.f32.mrf.mxu0  ;;  %3660 = vmatmul.mubr.f32.gmra.mxu0 %v258_v51  ;;  %v272_v51 = vld [vmem:[#allocation3 + $0x528] sm:$0xff] }
 0x18a   :  { %3662 = vmatprep.mubr.f32.mxu0 %v259_v24  ;;  %v663_v24 = vadd.f32 %v4205_v38, %v4277_v17 }
 0x18b   :  { %v4305_v59 = vpop.f32.mrf.mxu0 }
 0x18d   :  { %v3520_v18 = vpop.f32.mrf.mxu0  ;;  %3663 = vmatmul.mubr.f32.gmra.mxu0 %v260_v56  ;;  %v1775_v56 = vmax.f32 %v673_v26, 0.0  ;;  %v708_v26 = vadd.f32 %v4295_v43, %v4205_v38  ;;  %v623_v43 = vadd.f32 %v4205_v38, %v4229_v25  ;;  %v693_v25 = vadd.f32 %v4205_v38, %v4293_v40  ;;  %v284_v40 = vld [vmem:[#allocation3 + $0x588] sm:$0xff] }
 0x18e   :  { %3665 = vmatprep.mubr.f32.mxu0 %v261_v63  ;;  %v738_v2 = vadd.f32 %v3520_v18, %v4205_v38  ;;  %v653_v18 = vadd.f32 %v4205_v38, %v4265_v3  ;;  %v723_v3 = vadd.f32 %v4205_v38, %v4305_v59  ;;  %v638_v59 = vadd.f32 %v4235_v32, %v4205_v38  ;;  %v279_v32 = vld [vmem:[#allocation3 + $0x560] sm:$0xff] }
 0x18f   :  { %v4307_v50 = vpop.f32.mrf.mxu0 }
 0x190   :  { %v733_v17 = vadd.f32 %v4205_v38, %v4307_v50  ;;  %v1788_v46 = vmax.f32 %v738_v2, 0.0  ;;  %v648_v50 = vadd.f32 %v4247_v42, %v4205_v38  ;;  %v277_v42 = vld [vmem:[#allocation3 + $0x550] sm:$0xff]  ;;  %v282_v2 = vld [vmem:[#allocation3 + $0x578] sm:$0xff] }
 0x191   :  { %v3523_v6 = vpop.f32.mrf.mxu0  ;;  %3666 = vmatmul.mubr.f32.gmra.mxu0 %v262_v1  ;;  %v273_v1 = vld [vmem:[#allocation3 + $0x530] sm:$0xff] }
 0x192   :  { %3668 = vmatprep.mubr.f32.mxu0 %v263_v5  ;;  %v748_v23 = vadd.f32 %v3523_v6, %v4205_v38  ;;  %v658_v6 = vadd.f32 %v4259_v57, %v4205_v38  ;;  %v275_v57 = vld [vmem:[#allocation3 + $0x540] sm:$0xff] }
 0x193   :  { %v742_v8 = vpop.f32.mrf.mxu0 }
 0x194   :  { %v743_v47 = vadd.f32 %v4205_v38, %v742_v8  ;;  %v1790_v5 = vmax.f32 %v748_v23, 0.0 }
 0x195   :  { %v3526_v9 = vpop.f32.mrf.mxu0  ;;  %3669 = vmatmul.mubr.f32.gmra.mxu0 %v264_v20  ;;  %v1774_v20 = vmax.f32 %v668_v28, 0.0  ;;  %v280_v28 = vld [vmem:[#allocation3 + $0x568] sm:$0xff] }
 0x196   :  { %3671 = vmatprep.mubr.f32.mxu0 %v265_v52  ;;  %v758_v62 = vadd.f32 %v3526_v9, %v4205_v38  ;;  %v1789_v52 = vmax.f32 %v743_v47, 0.0  ;;  %v274_v9 = vld [vmem:[#allocation3 + $0x538] sm:$0xff] }
 0x197   :  { %v752_v14 = vpop.f32.mrf.mxu0 }
 0x198   :  { %v753_v33 = vadd.f32 %v4205_v38, %v752_v14  ;;  %v1792_v37 = vmax.f32 %v758_v62, 0.0  ;;  %v718_v62 = vadd.f32 %v4299_v54, %v4205_v38  ;;  %v633_v54 = vadd.f32 %v4205_v38, %v4241_v36 }
 0x199   :  { %v3529_v4 = vpop.f32.mrf.mxu0  ;;  %3672 = vmatmul.mubr.f32.gmra.mxu0 %v266_v11  ;;  %v1773_v11 = vmax.f32 %v663_v24, 0.0  ;;  %v703_v36 = vadd.f32 %v4205_v38, %v4297_v22  ;;  %v618_v22 = vadd.f32 %v4214_v61, %v4205_v38  ;;  %v283_v61 = vld [vmem:[#allocation3 + $0x580] sm:$0xff] }
 0x19a   :  { %v768_v19 = vadd.f32 %v3529_v4, %v4205_v38  ;;  %3674 = vmatprep.mubr.f32.mxu0 %v267_v13  ;;  %v1791_v30 = vmax.f32 %v753_v33, 0.0  ;;  %v728_v13 = vadd.f32 %v4303_v55, %v4205_v38  ;;  %v1772_v4 = vmax.f32 %v658_v6, 0.0  ;;  %v278_v33 = vld [vmem:[#allocation3 + $0x558] sm:$0xff] }
 0x19b   :  { %v762_v48 = vpop.f32.mrf.mxu0  ;;  %v643_v55 = vadd.f32 %v4205_v38, %v4253_v49  ;;  %v713_v49 = vadd.f32 %v4205_v38, %v4301_v53  ;;  %v628_v53 = vadd.f32 %v4224_v15, %v4205_v38  ;;  %v281_v15 = vld [vmem:[#allocation3 + $0x570] sm:$0xff] }
 0x19c   :  { %v1794_v10 = vmax.f32 %v768_v19, 0.0  ;;  %v763_v29 = vadd.f32 %v4205_v38, %v762_v48  ;;  %v1771_v48 = vmax.f32 %v653_v18, 0.0 }
 0x19d   :  { %v4316_v0 = vpop.f32.mrf.mxu0  ;;  %3675 = vmatmul.mubr.f32.gmra.mxu0 %v268_v16  ;;  %v1787_v16 = vmax.f32 %v733_v17, 0.0  ;;  %v1766_v24 = vmax.f32 %v628_v53, 0.0  ;;  %v1764_v17 = vmax.f32 %v618_v22, 0.0  ;;  %v296_v53 = vld [vmem:[#allocation3 + $0x5e8] sm:$0xff] }
 0x19e   :  { %v1793_v34 = vmax.f32 %v763_v29, 0.0  ;;  %3123 = vmatprep.subr.mxu1 %v1794_v10  ;;  %3677 = vmatprep.mubr.f32.mxu0 %v269_v27  ;;  %v1786_v10 = vmax.f32 %v728_v13, 0.0  ;;  %v1770_v29 = vmax.f32 %v648_v50, 0.0  ;;  %v1993_v13 = vld [vmem:[#allocation6 + $0x28] sm:$0xff]  ;;  %v286_v50 = vld [vmem:[#allocation3 + $0x598] sm:$0xff] }
 0x19f   :  { %v4321_v58 = vpop.f32.mrf.mxu0  ;;  %3124 = vmatpush3.msra.mxu1 %v1778_v31  ;;  %v1785_v31 = vmax.f32 %v723_v3, 0.0  ;;  %v287_v3 = vld [vmem:[#allocation3 + $0x5a0] sm:$0xff]  ;;  %v300_v22 = vld [vmem:[#allocation3 + $0x608] sm:$0xff] }
 0x1a0   :  { %3125 = vmatprep.subr.mxu1 %v1793_v34  ;;  %v1769_v34 = vmax.f32 %v643_v55, 0.0 }
 0x1a1   :  { %v4326_v45 = vpop.f32.mrf.mxu0  ;;  %3678 = vmatmul.mubr.f32.gmra.mxu0 %v270_v12  ;;  %3126 = vmatpush3.msra.mxu1 %v1777_v35  ;;  %v1784_v35 = vmax.f32 %v718_v62, 0.0  ;;  %v290_v62 = vld [vmem:[#allocation3 + $0x5b8] sm:$0xff] }
 0x1a2   :  { %3127 = vmatprep.subr.mxu1 %v1792_v37  ;;  %3680 = vmatprep.mubr.f32.mxu0 %v271_v44  ;;  %v1768_v44 = vmax.f32 %v638_v59, 0.0  ;;  %v1783_v37 = vmax.f32 %v713_v49, 0.0  ;;  %v291_v59 = vld [vmem:[#allocation3 + $0x5c0] sm:$0xff]  ;;  %v292_v49 = vld [vmem:[#allocation3 + $0x5c8] sm:$0xff] }
 0x1a3   :  { %v4331_v63 = vpop.f32.mrf.mxu0  ;;  %3128 = vmatpush3.msra.mxu1 %v1776_v60  ;;  %v1767_v60 = vmax.f32 %v633_v54, 0.0 }
 0x1a4   :  { %3129 = vmatprep.subr.mxu1 %v1791_v30  ;;  %v698_v30 = vadd.f32 %v4291_v39, %v4205_v38  ;;  %v613_v39 = vadd.f32 %v4205_v38, %v4219_v7  ;;  %v1990_v7 = vld [vmem:[#allocation6 + $0x10] sm:$0xff] }
 0x1a5   :  { %v4336_v8 = vpop.f32.mrf.mxu0  ;;  %3681 = vmatmul.mubr.f32.gmra.mxu0 %v272_v51  ;;  %3130 = vmatpush3.msra.mxu1 %v1775_v56  ;;  %v1782_v51 = vmax.f32 %v708_v26, 0.0  ;;  %v295_v26 = vld [vmem:[#allocation3 + $0x5e0] sm:$0xff] }
 0x1a6   :  { %3131 = vmatprep.subr.mxu1 %v1790_v5  ;;  %3683 = vmatprep.mubr.f32.mxu0 %v273_v1  ;;  %v1781_v1 = vmax.f32 %v703_v36, 0.0  ;;  %v1765_v5 = vmax.f32 %v623_v43, 0.0  ;;  %v1763_v18 = vmax.f32 %v613_v39, 0.0  ;;  %v297_v36 = vld [vmem:[#allocation3 + $0x5f0] sm:$0xff] }
 0x1a7   :  { %v4342_v14 = vpop.f32.mrf.mxu0  ;;  %3132 = vmatpush3.msra.mxu1 %v1774_v20  ;;  %v1780_v20 = vmax.f32 %v698_v30, 0.0 }
 0x1a8   :  { %3133 = vmatprep.subr.mxu1 %v1789_v52 }
 0x1a9   :  { %v4348_v19 = vpop.f32.mrf.mxu0  ;;  %3684 = vmatmul.mubr.f32.gmra.mxu0 %v274_v9  ;;  %3134 = vmatpush3.msra.mxu1 %v1773_v11  ;;  %v1779_v9 = vmax.f32 %v693_v25, 0.0 }
 0x1aa   :  { %3135 = vmatprep.subr.mxu1 %v1788_v46  ;;  %3686 = vmatprep.mubr.f32.mxu0 %v275_v57  ;;  %v285_v57 = vld [vmem:[#allocation3 + $0x590] sm:$0xff] }
 0x1ab   :  { %v4354_v27 = vpop.f32.mrf.mxu0  ;;  %3136 = vmatpush3.msra.mxu1 %v1772_v4 }
 0x1ac   :  { %3137 = vmatprep.subr.mxu1 %v1787_v16 }
 0x1ad   :  { %v4360_v41 = vpop.f32.mrf.mxu0  ;;  %3687 = vmatmul.mubr.f32.gmra.mxu0 %v276_v21  ;;  %3138 = vmatpush3.msra.mxu1 %v1771_v48  ;;  %v288_v21 = vld [vmem:[#allocation3 + $0x5a8] sm:$0xff]  ;;  %v289_v48 = vld [vmem:[#allocation3 + $0x5b0] sm:$0xff] }
 0x1ae   :  { %3139 = vmatprep.subr.mxu1 %v1786_v10  ;;  %3689 = vmatprep.mubr.f32.mxu0 %v277_v42 }
 0x1af   :  { %v4366_v12 = vpop.f32.mrf.mxu0  ;;  %3140 = vmatpush3.msra.mxu1 %v1770_v29 }
 0x1b0   :  { %3141 = vmatprep.subr.mxu1 %v1785_v31 }
 0x1b1   :  { %v4372_v23 = vpop.f32.mrf.mxu0  ;;  %3690 = vmatmul.mubr.f32.gmra.mxu0 %v278_v33  ;;  %3142 = vmatpush3.msra.mxu1 %v1769_v34  ;;  %v293_v33 = vld [vmem:[#allocation3 + $0x5d0] sm:$0xff]  ;;  %v294_v34 = vld [vmem:[#allocation3 + $0x5d8] sm:$0xff] }
 0x1b2   :  { %3143 = vmatprep.subr.mxu1 %v1784_v35  ;;  %3692 = vmatprep.mubr.f32.mxu0 %v279_v32 }
 0x1b3   :  { %v4378_v47 = vpop.f32.mrf.mxu0  ;;  %3144 = vmatpush3.msra.mxu1 %v1768_v44 }
 0x1b4   :  { %3145 = vmatprep.subr.mxu1 %v1783_v37 }
 0x1b5   :  { %v4384_v56 = vpop.f32.mrf.mxu0  ;;  %3693 = vmatmul.mubr.f32.gmra.mxu0 %v280_v28  ;;  %3146 = vmatpush3.msra.mxu1 %v1767_v60  ;;  %v298_v28 = vld [vmem:[#allocation3 + $0x5f8] sm:$0xff]  ;;  %v299_v60 = vld [vmem:[#allocation3 + $0x600] sm:$0xff] }
 0x1b6   :  { %3147 = vmatprep.subr.mxu1 %v1782_v51  ;;  %3695 = vmatprep.mubr.f32.mxu0 %v281_v15 }
 0x1b7   :  { %v4390_v6 = vpop.f32.mrf.mxu0  ;;  %3148 = vmatpush3.msra.mxu1 %v1766_v24 }
 0x1b8   :  { %3149 = vmatprep.subr.mxu1 %v1781_v1  ;;  %v301_v1 = vld [vmem:[#allocation3 + $0x610] sm:$0xff] }
 0x1b9   :  { %v3553_v52 = vpop.f32.mrf.mxu0  ;;  %3696 = vmatmul.mubr.f32.gmra.mxu0 %v282_v2  ;;  %3150 = vmatpush3.msra.mxu1 %v1765_v5 }
 0x1ba   :  { %3151 = vmatprep.subr.mxu1 %v1780_v20  ;;  %3698 = vmatprep.mubr.f32.mxu0 %v283_v61  ;;  %v848_v15 = vadd.f32 %v3553_v52, %v4205_v38  ;;  %v838_v61 = vadd.f32 %v4384_v56, %v4205_v38 }
 0x1bb   :  { %v842_v11 = vpop.f32.mrf.mxu0  ;;  %3152 = vmatpush3.msra.mxu1 %v1764_v17 }
 0x1bc   :  { %3153 = vmatprep.subr.mxu1 %v1779_v9  ;;  %v843_v24 = vadd.f32 %v4205_v38, %v842_v11  ;;  %v1810_v20 = vmax.f32 %v848_v15, 0.0 }
 0x1bd   :  { %v4392_v46 = vpop.f32.mrf.mxu0  ;;  %3699 = vmatmul.mubr.f32.gmra.mxu0 %v284_v40  ;;  %3154 = vmatpush3.msra.mxu1 %v1763_v18  ;;  %v302_v40 = vld [vmem:[#allocation3 + $0x618] sm:$0xff]  ;;  %v833_v18 = vadd.f32 %v4205_v38, %v4390_v6 }
 0x1be   :  { %3701 = vmatprep.mubr.f32.mxu0 %v285_v57  ;;  %2139 = vmatmul.mubr.f32.vlgmr.msra.gmra.mxu1 %v1990_v7  ;;  %v1809_v11 = vmax.f32 %v843_v24, 0.0  ;;  %v303_v7 = vld [vmem:[#allocation3 + $0x620] sm:$0xff]  ;;  %v308_v24 = vld [vmem:[#allocation3 + $0x648] sm:$0xff] }
 0x1bf   :  { %v4394_v4 = vpop.f32.mrf.mxu0  ;;  %2208 = vmatprep.mubr.f32.mxu1 %v1993_v13 }
 0x1c1   :  { %v4396_v16 = vpop.f32.mrf.mxu0  ;;  %3702 = vmatmul.mubr.f32.gmra.mxu0 %v286_v50  ;;  %v828_v50 = vadd.f32 %v4372_v23, %v4205_v38 }
 0x1c2   :  { %3704 = vmatprep.mubr.f32.mxu0 %v287_v3  ;;  %v1808_v3 = vmax.f32 %v838_v61, 0.0 }
 0x1c3   :  { %v4398_v55 = vpop.f32.mrf.mxu0 }
 0x1c5   :  { %v4400_v42 = vpop.f32.mrf.mxu0  ;;  %3705 = vmatmul.mubr.f32.gmra.mxu0 %v288_v21 }
 0x1c6   :  { %3707 = vmatprep.mubr.f32.mxu0 %v289_v48 }
 0x1c7   :  { %v4402_v10 = vpop.f32.mrf.mxu0 }
 0x1c9   :  { %v4404_v29 = vpop.f32.mrf.mxu0  ;;  %3708 = vmatmul.mubr.f32.gmra.mxu0 %v290_v62  ;;  %v304_v62 = vld [vmem:[#allocation3 + $0x628] sm:$0xff] }
 0x1ca   :  { %3710 = vmatprep.mubr.f32.mxu0 %v291_v59  ;;  %v823_v59 = vadd.f32 %v4205_v38, %v4378_v47 }
 0x1cb   :  { %v4406_v31 = vpop.f32.mrf.mxu0 }
 0x1cd   :  { %v3568_v54 = vpop.f32.mrf.mxu0  ;;  %3711 = vmatmul.mubr.f32.gmra.mxu0 %v292_v49  ;;  %v1807_v49 = vmax.f32 %v833_v18, 0.0 }
 0x1ce   :  { %3713 = vmatprep.mubr.f32.mxu0 %v293_v33  ;;  %v898_v23 = vadd.f32 %v3568_v54, %v4205_v38  ;;  %v813_v54 = vadd.f32 %v4205_v38, %v4366_v12  ;;  %v883_v12 = vadd.f32 %v4205_v38, %v4406_v31 }
 0x1cf   :  { %v4408_v32 = vpop.f32.mrf.mxu0 }
 0x1d0   :  { %v893_v47 = vadd.f32 %v4205_v38, %v4408_v32  ;;  %v1820_v15 = vmax.f32 %v898_v23, 0.0  ;;  %v808_v32 = vadd.f32 %v4348_v19, %v4205_v38  ;;  %v878_v19 = vadd.f32 %v4400_v42, %v4205_v38 }
 0x1d1   :  { %v3571_v35 = vpop.f32.mrf.mxu0  ;;  %3714 = vmatmul.mubr.f32.gmra.mxu0 %v294_v34  ;;  %v305_v34 = vld [vmem:[#allocation3 + $0x630] sm:$0xff]  ;;  %v1817_v61 = vmax.f32 %v883_v12, 0.0 }
 0x1d2   :  { %3716 = vmatprep.mubr.f32.mxu0 %v295_v26  ;;  %v908_v56 = vadd.f32 %v3571_v35, %v4205_v38  ;;  %v818_v35 = vadd.f32 %v4360_v41, %v4205_v38  ;;  %v307_v41 = vld [vmem:[#allocation3 + $0x640] sm:$0xff]  ;;  %v1802_v31 = vmax.f32 %v808_v32, 0.0 }
 0x1d3   :  { %v902_v44 = vpop.f32.mrf.mxu0 }
 0x1d4   :  { %v903_v48 = vadd.f32 %v4205_v38, %v902_v44  ;;  %v1822_v26 = vmax.f32 %v908_v56, 0.0 }
 0x1d5   :  { %v3574_v37 = vpop.f32.mrf.mxu0  ;;  %3717 = vmatmul.mubr.f32.gmra.mxu0 %v296_v53  ;;  %v1806_v53 = vmax.f32 %v828_v50, 0.0  ;;  %v778_v50 = vadd.f32 %v4316_v0, %v4205_v38 }
 0x1d6   :  { %3719 = vmatprep.mubr.f32.mxu0 %v297_v36  ;;  %v918_v2 = vadd.f32 %v3574_v37, %v4205_v38  ;;  %v1821_v36 = vmax.f32 %v903_v48, 0.0  ;;  %v306_v37 = vld [vmem:[#allocation3 + $0x638] sm:$0xff] }
 0x1d7   :  { %v912_v43 = vpop.f32.mrf.mxu0 }
 0x1d8   :  { %v913_v52 = vadd.f32 %v4205_v38, %v912_v43  ;;  %v1824_v13 = vmax.f32 %v918_v2, 0.0 }
 0x1d9   :  { %v3577_v30 = vpop.f32.mrf.mxu0  ;;  %3720 = vmatmul.mubr.f32.gmra.mxu0 %v298_v28  ;;  %v1805_v28 = vmax.f32 %v823_v59, 0.0 }
 0x1da   :  { %v928_v51 = vadd.f32 %v3577_v30, %v4205_v38  ;;  %3722 = vmatprep.mubr.f32.mxu0 %v299_v60  ;;  %v1823_v6 = vmax.f32 %v913_v52, 0.0  ;;  %v888_v60 = vadd.f32 %v4404_v29, %v4205_v38  ;;  %v1804_v30 = vmax.f32 %v818_v35, 0.0  ;;  %v1992_v35 = vld [vmem:[#allocation6 + $0x20] sm:$0xff] }
 0x1db   :  { %v922_v25 = vpop.f32.mrf.mxu0  ;;  %v803_v29 = vadd.f32 %v4205_v38, %v4354_v27  ;;  %v873_v27 = vadd.f32 %v4205_v38, %v4402_v10  ;;  %v863_v10 = vadd.f32 %v4205_v38, %v4398_v55  ;;  %v853_v55 = vadd.f32 %v4205_v38, %v4394_v4  ;;  %v1995_v4 = vld [vmem:[#allocation6 + $0x38] sm:$0xff] }
 0x1dc   :  { %v1826_v39 = vmax.f32 %v928_v51, 0.0  ;;  %v923_v5 = vadd.f32 %v4205_v38, %v922_v25  ;;  %v1803_v25 = vmax.f32 %v813_v54, 0.0  ;;  %v1818_v2 = vmax.f32 %v888_v60, 0.0 }
 0x1dd   :  { %v4417_v17 = vpop.f32.mrf.mxu0  ;;  %3723 = vmatmul.mubr.f32.gmra.mxu0 %v300_v22  ;;  %v1819_v22 = vmax.f32 %v893_v47, 0.0  ;;  %v1801_v52 = vmax.f32 %v803_v29, 0.0  ;;  %v1811_v0 = vmax.f32 %v853_v55, 0.0 }
 0x1de   :  { %v1825_v9 = vmax.f32 %v923_v5, 0.0  ;;  %3158 = vmatprep.subr.mxu1 %v1826_v39  ;;  %3725 = vmatprep.mubr.f32.mxu0 %v301_v1  ;;  %v798_v39 = vadd.f32 %v4336_v8, %v4205_v38  ;;  %v868_v8 = vadd.f32 %v4396_v16, %v4205_v38  ;;  %v858_v16 = vadd.f32 %v4392_v46, %v4205_v38 }
 0x1df   :  { %v4422_v57 = vpop.f32.mrf.mxu0  ;;  %3159 = vmatpush3.msra.mxu1 %v1810_v20  ;;  %v793_v20 = vadd.f32 %v4205_v38, %v4342_v14  ;;  %v1815_v14 = vmax.f32 %v873_v27, 0.0 }
 0x1e0   :  { %3160 = vmatprep.subr.mxu1 %v1825_v9  ;;  %v1816_v9 = vmax.f32 %v878_v19, 0.0  ;;  %v1800_v18 = vmax.f32 %v798_v39, 0.0  ;;  %v1812_v46 = vmax.f32 %v858_v16, 0.0 }
 0x1e1   :  { %v4427_v21 = vpop.f32.mrf.mxu0  ;;  %3161 = vmatpush3.msra.mxu1 %v1809_v11  ;;  %3726 = vmatmul.mubr.f32.gmra.mxu0 %v302_v40  ;;  %v788_v40 = vadd.f32 %v4326_v45, %v4205_v38  ;;  %v1799_v56 = vmax.f32 %v793_v20, 0.0  ;;  %v1814_v45 = vmax.f32 %v868_v8, 0.0 }
 0x1e2   :  { %3162 = vmatprep.subr.mxu1 %v1824_v13  ;;  %3728 = vmatprep.mubr.f32.mxu0 %v303_v7  ;;  %v783_v7 = vadd.f32 %v4205_v38, %v4331_v63  ;;  %v773_v63 = vadd.f32 %v4205_v38, %v4321_v58 }
 0x1e3   :  { %v4432_v33 = vpop.f32.mrf.mxu0  ;;  %3163 = vmatpush3.msra.mxu1 %v1808_v3  ;;  %v1798_v3 = vmax.f32 %v788_v40, 0.0 }
 0x1e4   :  { %3164 = vmatprep.subr.mxu1 %v1823_v6  ;;  %v1813_v6 = vmax.f32 %v863_v10, 0.0  ;;  %v1795_v23 = vmax.f32 %v773_v63, 0.0 }
 0x1e5   :  { %v4437_v44 = vpop.f32.mrf.mxu0  ;;  %3165 = vmatpush3.msra.mxu1 %v1807_v49  ;;  %3729 = vmatmul.mubr.f32.gmra.mxu0 %v304_v62  ;;  %v1797_v62 = vmax.f32 %v783_v7, 0.0  ;;  %v1796_v49 = vmax.f32 %v778_v50, 0.0 }
 0x1e6   :  { %3166 = vmatprep.subr.mxu1 %v1822_v26  ;;  %3731 = vmatprep.mubr.f32.mxu0 %v305_v34 }
 0x1e7   :  { %v4443_v43 = vpop.f32.mrf.mxu0  ;;  %3167 = vmatpush3.msra.mxu1 %v1806_v53 }
 0x1e8   :  { %3168 = vmatprep.subr.mxu1 %v1821_v36 }
 0x1e9   :  { %v4449_v51 = vpop.f32.mrf.mxu0  ;;  %3169 = vmatpush3.msra.mxu1 %v1805_v28  ;;  %3732 = vmatmul.mubr.f32.gmra.mxu0 %v306_v37  ;;  %v4499_v37 = vpop.f32.mrf.mxu1 }
 0x1ea   :  { %3170 = vmatprep.subr.mxu1 %v1820_v15  ;;  %3734 = vmatprep.mubr.f32.mxu0 %v307_v41 }
 0x1eb   :  { %v4455_v1 = vpop.f32.mrf.mxu0  ;;  %3171 = vmatpush3.msra.mxu1 %v1804_v30  ;;  %v4505_v41 = vpop.f32.mrf.mxu1 }
 0x1ec   :  { %3172 = vmatprep.subr.mxu1 %v1819_v22 }
 0x1ed   :  { %v4461_v5 = vpop.f32.mrf.mxu0  ;;  %3173 = vmatpush3.msra.mxu1 %v1803_v25  ;;  %3735 = vmatmul.mubr.f32.gmra.mxu0 %v308_v24  ;;  %v4509_v32 = vpop.f32.mrf.mxu1 }
 0x1ee   :  { %3174 = vmatprep.subr.mxu1 %v1818_v2  ;;  %v4518_v2 = vld [vmem:[%s5031_s3] ss:$0 sm:$0xff] }
 0x1ef   :  { %v4467_v42 = vpop.f32.mrf.mxu0  ;;  %3175 = vmatpush3.msra.mxu1 %v1802_v31  ;;  %v4511_v22 = vpop.f32.mrf.mxu1 }
 0x1f0   :  { %3176 = vmatprep.subr.mxu1 %v1817_v61 }
 0x1f1   :  { %v4473_v11 = vpop.f32.mrf.mxu0  ;;  %3177 = vmatpush3.msra.mxu1 %v1801_v52  ;;  %v4513_v25 = vpop.f32.mrf.mxu1 }
 0x1f2   :  { %3178 = vmatprep.subr.mxu1 %v1816_v9 }
 0x1f3   :  { %v4479_v13 = vpop.f32.mrf.mxu0  ;;  %3179 = vmatpush3.msra.mxu1 %v1800_v18  ;;  %v4521_v27 = vpop.f32.mrf.mxu1 }
 0x1f4   :  { %3180 = vmatprep.subr.mxu1 %v1815_v14 }
 0x1f5   :  { %v3598_v48 = vpop.f32.mrf.mxu0  ;;  %3181 = vmatpush3.msra.mxu1 %v1799_v56  ;;  %v4530_v7 = vpop.f32.mrf.mxu1 }
 0x1f6   :  { %3182 = vmatprep.subr.mxu1 %v1814_v45  ;;  %v998_v18 = vadd.f32 %v4518_v2, %v3598_v48  ;;  %5039 = vst [vmem:[#allocation17_spill] sm:$0xff] %v4530_v7  ;;  %v988_v48 = vadd.f32 %v4518_v2, %v4473_v11 }
 0x1f7   :  { %v992_v59 = vpop.f32.mrf.mxu0  ;;  %3183 = vmatpush3.msra.mxu1 %v1798_v3 }
 0x1f8   :  { %3184 = vmatprep.subr.mxu1 %v1813_v6  ;;  %v993_v45 = vadd.f32 %v4518_v2, %v992_v59  ;;  %v1840_v63 = vmax.f32 %v998_v18, 0.0 }
 0x1f9   :  { %v3601_v34 = vpop.f32.mrf.mxu0  ;;  %3185 = vmatpush3.msra.mxu1 %v1797_v62 }
 0x1fa   :  { %3186 = vmatprep.subr.mxu1 %v1812_v46  ;;  %v1008_v39 = vadd.f32 %v4518_v2, %v3601_v34  ;;  %v4541_v46 = vpop.f32.mrf.mxu1  ;;  %v983_v34 = vadd.f32 %v4518_v2, %v4479_v13 }
 0x1fb   :  { %v1002_v26 = vpop.f32.mrf.mxu0  ;;  %3187 = vmatpush3.msra.mxu1 %v1796_v49  ;;  %5040 = vst [vmem:[#allocation18_spill] sm:$0xff] %v4541_v46 }
 0x1fc   :  { %3188 = vmatprep.subr.mxu1 %v1811_v0  ;;  %v1003_v20 = vadd.f32 %v4518_v2, %v1002_v26  ;;  %v1842_v10 = vmax.f32 %v1008_v39, 0.0  ;;  %v1839_v0 = vmax.f32 %v993_v45, 0.0  ;;  %v1837_v39 = vmax.f32 %v983_v34, 0.0 }
 0x1fd   :  { %v4489_v53 = vpop.f32.mrf.mxu0  ;;  %3189 = vmatpush3.msra.mxu1 %v1795_v23  ;;  %v943_v34 = vadd.f32 %v4518_v2, %v4432_v33 }
 0x1fe   :  { %2209 = vmatmul.mubr.f32.vlgmr.msra.gmra.mxu1 %v1992_v35  ;;  %v1841_v50 = vmax.f32 %v1003_v20, 0.0  ;;  %v978_v35 = vadd.f32 %v4518_v2, %v4461_v5 }
 0x1ff   :  { %v4491_v38 = vpop.f32.mrf.mxu0  ;;  %2278 = vmatprep.mubr.f32.mxu1 %v1995_v4  ;;  %v1838_v4 = vmax.f32 %v988_v48, 0.0  ;;  %v948_v48 = vadd.f32 %v4518_v2, %v4427_v21  ;;  %v1018_v21 = vadd.f32 %v4518_v2, %v4489_v53 }
 0x200   :  { %v1836_v20 = vmax.f32 %v978_v35, 0.0  ;;  %v1013_v33 = vadd.f32 %v4518_v2, %v4491_v38  ;;  %v1994_v38 = vld [vmem:[#allocation6 + $0x30] sm:$0xff] }
 0x201   :  { %v4493_v58 = vpop.f32.mrf.mxu0  ;;  %v1830_v35 = vmax.f32 %v948_v48, 0.0 }
 0x203   :  { %v4495_v47 = vpop.f32.mrf.mxu0 }
 0x205   :  { %v4497_v36 = vpop.f32.mrf.mxu0 }
 0x207   :  { %v4501_v54 = vpop.f32.mrf.mxu0 }
 0x209   :  { %v4503_v28 = vpop.f32.mrf.mxu0 }
 0x20a   :  { %v1048_v5 = vadd.f32 %v4518_v2, %v4503_v28 }
 0x20b   :  { %v4507_v60 = vpop.f32.mrf.mxu0 }
 0x20c   :  { %v1850_v18 = vmax.f32 %v1048_v5, 0.0 }
 0x20d   :  { %v3616_v15 = vpop.f32.mrf.mxu0 }
 0x20e   :  { %v1058_v26 = vadd.f32 %v4518_v2, %v3616_v15 }
 0x20f   :  { %v1052_v30 = vpop.f32.mrf.mxu0 }
 0x211   :  { %v3619_v12 = vpop.f32.mrf.mxu0 }
 0x212   :  { %v1068_v55 = vadd.f32 %v4518_v2, %v3619_v12 }
 0x213   :  { %v1062_v24 = vpop.f32.mrf.mxu0 }
 0x214   :  { %v1063_v49 = vadd.f32 %v4518_v2, %v1062_v24  ;;  %v1854_v11 = vmax.f32 %v1068_v55, 0.0  ;;  %v4553_v24 = vpop.f32.mrf.mxu1 }
 0x215   :  { %v3622_v29 = vpop.f32.mrf.mxu0 }
 0x216   :  { %v1078_v8 = vadd.f32 %v4518_v2, %v3622_v29  ;;  %v1053_v29 = vadd.f32 %v4518_v2, %v1052_v30  ;;  %v1853_v13 = vmax.f32 %v1063_v49, 0.0  ;;  %v4566_v30 = vpop.f32.mrf.mxu1 }
 0x217   :  { %v1072_v19 = vpop.f32.mrf.mxu0  ;;  %5041 = vst [vmem:[#allocation19_spill] sm:$0xff] %v4566_v30 }
 0x218   :  { %v1073_v56 = vadd.f32 %v4518_v2, %v1072_v19  ;;  %v1856_v6 = vmax.f32 %v1078_v8, 0.0  ;;  %v973_v19 = vadd.f32 %v4518_v2, %v4467_v42  ;;  %v1043_v42 = vadd.f32 %v4518_v2, %v4507_v60  ;;  %v4580_v60 = vpop.f32.mrf.mxu1 }
 0x219   :  { %v3625_v31 = vpop.f32.mrf.mxu0  ;;  %v1851_v8 = vmax.f32 %v1053_v29, 0.0 }
 0x21a   :  { %v1088_v61 = vadd.f32 %v4518_v2, %v3625_v31  ;;  %v1855_v59 = vmax.f32 %v1073_v56, 0.0  ;;  %v1852_v31 = vmax.f32 %v1058_v26, 0.0  ;;  %v1835_v28 = vmax.f32 %v973_v19, 0.0 }
 0x21b   :  { %v1082_v52 = vpop.f32.mrf.mxu0  ;;  %v1849_v45 = vmax.f32 %v1043_v42, 0.0  ;;  %v1829_v19 = vmax.f32 %v943_v34, 0.0 }
 0x21c   :  { %v1858_v9 = vmax.f32 %v1088_v61, 0.0  ;;  %v1083_v40 = vadd.f32 %v4518_v2, %v1082_v52  ;;  %v968_v61 = vadd.f32 %v4518_v2, %v4449_v51  ;;  %v1038_v51 = vadd.f32 %v4518_v2, %v4497_v36 }
 0x21d   :  { %v4528_v14 = vpop.f32.mrf.mxu0 }
 0x21e   :  { %v1857_v16 = vmax.f32 %v1083_v40, 0.0  ;;  %3193 = vmatprep.subr.mxu1 %v1858_v9  ;;  %v963_v9 = vadd.f32 %v4518_v2, %v4455_v1  ;;  %v1834_v56 = vmax.f32 %v968_v61, 0.0  ;;  %v1033_v1 = vadd.f32 %v4518_v2, %v4501_v54  ;;  %v4594_v54 = vpop.f32.mrf.mxu1 }
 0x21f   :  { %v4534_v3 = vpop.f32.mrf.mxu0  ;;  %3194 = vmatpush3.msra.mxu1 %v1842_v10  ;;  %v958_v10 = vadd.f32 %v4518_v2, %v4437_v44  ;;  %v1028_v44 = vadd.f32 %v4518_v2, %v4493_v58  ;;  %v1843_v61 = vmax.f32 %v1013_v33, 0.0 }
 0x220   :  { %3195 = vmatprep.subr.mxu1 %v1857_v16  ;;  %v1833_v36 = vmax.f32 %v963_v9, 0.0 }
 0x221   :  { %v4539_v62 = vpop.f32.mrf.mxu0  ;;  %3196 = vmatpush3.msra.mxu1 %v1841_v50  ;;  %v953_v50 = vadd.f32 %v4518_v2, %v4443_v43  ;;  %v1023_v43 = vadd.f32 %v4518_v2, %v4495_v47  ;;  %v1846_v26 = vmax.f32 %v1028_v44, 0.0  ;;  %v4606_v47 = vpop.f32.mrf.mxu1 }
 0x222   :  { %3197 = vmatprep.subr.mxu1 %v1856_v6  ;;  %v1848_v6 = vmax.f32 %v1038_v51, 0.0 }
 0x223   :  { %v4546_v23 = vpop.f32.mrf.mxu0  ;;  %3198 = vmatpush3.msra.mxu1 %v1840_v63  ;;  %v1832_v63 = vmax.f32 %v958_v10, 0.0  ;;  %v1831_v58 = vmax.f32 %v953_v50, 0.0  ;;  %v1845_v29 = vmax.f32 %v1023_v43, 0.0 }
 0x224   :  { %3199 = vmatprep.subr.mxu1 %v1855_v59  ;;  %v1847_v59 = vmax.f32 %v1033_v1, 0.0 }
 0x225   :  { %v4551_v12 = vpop.f32.mrf.mxu0  ;;  %3200 = vmatpush3.msra.mxu1 %v1839_v0 }
 0x226   :  { %3201 = vmatprep.subr.mxu1 %v1854_v11  ;;  %v938_v11 = vadd.f32 %v4518_v2, %v4417_v17 }
 0x227   :  { %v4558_v15 = vpop.f32.mrf.mxu0  ;;  %3202 = vmatpush3.msra.mxu1 %v1838_v4 }
 0x228   :  { %3203 = vmatprep.subr.mxu1 %v1853_v13  ;;  %v933_v13 = vadd.f32 %v4518_v2, %v4422_v57  ;;  %v1828_v5 = vmax.f32 %v938_v11, 0.0 }
 0x229   :  { %v4564_v52 = vpop.f32.mrf.mxu0  ;;  %3204 = vmatpush3.msra.mxu1 %v1837_v39  ;;  %v1844_v39 = vmax.f32 %v1018_v21, 0.0 }
 0x22a   :  { %3205 = vmatprep.subr.mxu1 %v1852_v31  ;;  %v4612_v31 = vpop.f32.mrf.mxu1 }
 0x22b   :  { %v4572_v40 = vpop.f32.mrf.mxu0  ;;  %3206 = vmatpush3.msra.mxu1 %v1836_v20  ;;  %v1827_v20 = vmax.f32 %v933_v13, 0.0 }
 0x22c   :  { %3207 = vmatprep.subr.mxu1 %v1851_v8  ;;  %v1997_v8 = vld [vmem:[#allocation6 + $0x48] sm:$0xff]  ;;  %v4616_v57 = vpop.f32.mrf.mxu1 }
 0x22d   :  { %v4578_v16 = vpop.f32.mrf.mxu0  ;;  %3208 = vmatpush3.msra.mxu1 %v1835_v28 }
 0x22e   :  { %3209 = vmatprep.subr.mxu1 %v1850_v18  ;;  %v4622_v18 = vpop.f32.mrf.mxu1 }
 0x22f   :  { %v4586_v55 = vpop.f32.mrf.mxu0  ;;  %3210 = vmatpush3.msra.mxu1 %v1834_v56 }
 0x230   :  { %3211 = vmatprep.subr.mxu1 %v1849_v45  ;;  %v4628_v1 = vpop.f32.mrf.mxu1 }
 0x231   :  { %v4592_v49 = vpop.f32.mrf.mxu0  ;;  %3212 = vmatpush3.msra.mxu1 %v1833_v36 }
 0x232   :  { %3213 = vmatprep.subr.mxu1 %v1848_v6  ;;  %v4632_v36 = vpop.f32.mrf.mxu1 }
 0x233   :  { %v4600_v0 = vpop.f32.mrf.mxu0  ;;  %3214 = vmatpush3.msra.mxu1 %v1832_v63 }
 0x234   :  { %3215 = vmatprep.subr.mxu1 %v1847_v59  ;;  %v4636_v48 = vpop.f32.mrf.mxu1 }
 0x235   :  { %v3646_v4 = vpop.f32.mrf.mxu0  ;;  %3216 = vmatpush3.msra.mxu1 %v1831_v58 }
 0x236   :  { %3217 = vmatprep.subr.mxu1 %v1846_v26  ;;  %v4638_v59 = vpop.f32.mrf.mxu1 }
 0x237   :  { %v1152_v53 = vpop.f32.mrf.mxu0  ;;  %3218 = vmatpush3.msra.mxu1 %v1830_v35 }
 0x238   :  { %3219 = vmatprep.subr.mxu1 %v1845_v29  ;;  %v4640_v21 = vpop.f32.mrf.mxu1 }
 0x239   :  { %v3649_v17 = vpop.f32.mrf.mxu0  ;;  %3220 = vmatpush3.msra.mxu1 %v1829_v19 }
 0x23a   :  { %3221 = vmatprep.subr.mxu1 %v1844_v39  ;;  %v1168_v11 = vadd.f32 %v4518_v2, %v3649_v17  ;;  %v4643_v33 = vpop.f32.mrf.mxu1 }
 0x23b   :  { %v1162_v42 = vpop.f32.mrf.mxu0  ;;  %3222 = vmatpush3.msra.mxu1 %v1828_v5 }
 0x23c   :  { %3223 = vmatprep.subr.mxu1 %v1843_v61  ;;  %v1163_v13 = vadd.f32 %v4518_v2, %v1162_v42  ;;  %v4652_v46 = vpop.f32.mrf.mxu1 }
 0x23d   :  { %v4614_v9 = vpop.f32.mrf.mxu0  ;;  %3224 = vmatpush3.msra.mxu1 %v1827_v20  ;;  %v1158_v20 = vadd.f32 %v4518_v2, %v3646_v4  ;;  %5042 = vst [vmem:[#allocation20_spill] sm:$0xff] %v4652_v46  ;;  %v1148_v4 = vadd.f32 %v4518_v2, %v4592_v49 }
 0x23e   :  { %2279 = vmatmul.mubr.f32.vlgmr.msra.gmra.mxu1 %v1994_v38  ;;  %v1874_v38 = vmax.f32 %v1168_v11, 0.0  ;;  %v1873_v42 = vmax.f32 %v1163_v13, 0.0  ;;  %v1143_v13 = vadd.f32 %v4518_v2, %v4600_v0 }
 0x23f   :  { %v4618_v28 = vpop.f32.mrf.mxu0  ;;  %2348 = vmatprep.mubr.f32.mxu1 %v1997_v8  ;;  %v1872_v11 = vmax.f32 %v1158_v20, 0.0  ;;  %v1870_v20 = vmax.f32 %v1148_v4, 0.0 }
 0x241   :  { %v4620_v51 = vpop.f32.mrf.mxu0 }
 0x243   :  { %v4624_v10 = vpop.f32.mrf.mxu0 }
 0x245   :  { %v4626_v56 = vpop.f32.mrf.mxu0 }
 0x247   :  { %v4630_v45 = vpop.f32.mrf.mxu0 }
 0x249   :  { %v3661_v50 = vpop.f32.mrf.mxu0 }
 0x24b   :  { %v4634_v44 = vpop.f32.mrf.mxu0 }
 0x24d   :  { %v3664_v6 = vpop.f32.mrf.mxu0 }
 0x24f   :  { %v1212_v63 = vpop.f32.mrf.mxu0 }
 0x251   :  { %v3667_v43 = vpop.f32.mrf.mxu0 }
 0x253   :  { %v1222_v34 = vpop.f32.mrf.mxu0 }
 0x255   :  { %v3670_v58 = vpop.f32.mrf.mxu0 }
 0x256   :  { %v1238_v39 = vadd.f32 %v4518_v2, %v3670_v58  ;;  %v1228_v58 = vadd.f32 %v4518_v2, %v3667_v43 }
 0x257   :  { %v1232_v26 = vpop.f32.mrf.mxu0 }
 0x258   :  { %v1233_v17 = vadd.f32 %v4518_v2, %v1232_v26  ;;  %v4663_v26 = vpop.f32.mrf.mxu1  ;;  %v1886_v49 = vmax.f32 %v1228_v58, 0.0  ;;  %v1208_v58 = vadd.f32 %v4518_v2, %v3661_v50 }
 0x259   :  { %v3673_v35 = vpop.f32.mrf.mxu0  ;;  %5043 = vst [vmem:[#allocation21_spill] sm:$0xff] %v4663_v26 }
 0x25a   :  { %v1248_v29 = vadd.f32 %v4518_v2, %v3673_v35  ;;  %v1153_v35 = vadd.f32 %v4518_v2, %v1152_v53  ;;  %v1887_v53 = vmax.f32 %v1233_v17, 0.0  ;;  %v1213_v17 = vadd.f32 %v4518_v2, %v1212_v63 }
 0x25b   :  { %v1242_v19 = vpop.f32.mrf.mxu0 }
 0x25c   :  { %v1890_v5 = vmax.f32 %v1248_v29, 0.0  ;;  %v1243_v61 = vadd.f32 %v4518_v2, %v1242_v19  ;;  %v1888_v29 = vmax.f32 %v1238_v39, 0.0  ;;  %v1138_v39 = vadd.f32 %v4518_v2, %v4578_v16 }
 0x25d   :  { %v4650_v8 = vpop.f32.mrf.mxu0 }
 0x25e   :  { %v1889_v7 = vmax.f32 %v1243_v61, 0.0  ;;  %3228 = vmatprep.subr.mxu1 %v1890_v5  ;;  %v1223_v5 = vadd.f32 %v4518_v2, %v1222_v34  ;;  %v1871_v61 = vmax.f32 %v1153_v35, 0.0  ;;  %v4675_v34 = vpop.f32.mrf.mxu1  ;;  %v1133_v35 = vadd.f32 %v4518_v2, %v4586_v55 }
 0x25f   :  { %v4656_v30 = vpop.f32.mrf.mxu0  ;;  %3229 = vmatpush3.msra.mxu1 %v1874_v38  ;;  %5044 = vst [vmem:[#allocation22_spill] sm:$0xff] %v4675_v34  ;;  %v1868_v4 = vmax.f32 %v1138_v39, 0.0  ;;  %v1203_v55 = vadd.f32 %v4518_v2, %v4634_v44 }
 0x260   :  { %3230 = vmatprep.subr.mxu1 %v1889_v7  ;;  %v1218_v7 = vadd.f32 %v4518_v2, %v3664_v6  ;;  %v1885_v0 = vmax.f32 %v1223_v5, 0.0  ;;  %v4687_v63 = vpop.f32.mrf.mxu1  ;;  %v1883_v5 = vmax.f32 %v1213_v17, 0.0  ;;  %v1867_v50 = vmax.f32 %v1133_v35, 0.0 }
 0x261   :  { %v4661_v19 = vpop.f32.mrf.mxu0  ;;  %3231 = vmatpush3.msra.mxu1 %v1873_v42  ;;  %v1869_v42 = vmax.f32 %v1143_v13, 0.0  ;;  %5045 = vst [vmem:[#allocation23_spill] sm:$0xff] %v4687_v63  ;;  %v1113_v17 = vadd.f32 %v4518_v2, %v4558_v15  ;;  %v1183_v15 = vadd.f32 %v4518_v2, %v4624_v10 }
 0x262   :  { %3232 = vmatprep.subr.mxu1 %v1888_v29  ;;  %v1884_v16 = vmax.f32 %v1218_v7, 0.0  ;;  %v1128_v29 = vadd.f32 %v4518_v2, %v4564_v52  ;;  %v1198_v52 = vadd.f32 %v4518_v2, %v4626_v56  ;;  %v1118_v7 = vadd.f32 %v4518_v2, %v4551_v12  ;;  %v4701_v44 = vpop.f32.mrf.mxu1 }
 0x263   :  { %v4668_v43 = vpop.f32.mrf.mxu0  ;;  %3233 = vmatpush3.msra.mxu1 %v1872_v11  ;;  %5046 = vst [vmem:[#allocation24_spill] sm:$0xff] %v4701_v44  ;;  %v1188_v12 = vadd.f32 %v4518_v2, %v4620_v51  ;;  %v1863_v51 = vmax.f32 %v1113_v17, 0.0 }
 0x264   :  { %3234 = vmatprep.subr.mxu1 %v1887_v53  ;;  %v1123_v53 = vadd.f32 %v4518_v2, %v4572_v40  ;;  %v1193_v40 = vadd.f32 %v4518_v2, %v4630_v45  ;;  %v1880_v35 = vmax.f32 %v1198_v52, 0.0  ;;  %v4715_v45 = vpop.f32.mrf.mxu1 }
 0x265   :  { %v4673_v38 = vpop.f32.mrf.mxu0  ;;  %3235 = vmatpush3.msra.mxu1 %v1871_v61  ;;  %v1882_v61 = vmax.f32 %v1208_v58, 0.0  ;;  %v1864_v58 = vmax.f32 %v1118_v7, 0.0  ;;  %5047 = vst [vmem:[#allocation25_spill] sm:$0xff] %v4715_v45  ;;  %v1093_v7 = vadd.f32 %v4518_v2, %v4534_v3 }
 0x266   :  { %3236 = vmatprep.subr.mxu1 %v1886_v49  ;;  %v1866_v49 = vmax.f32 %v1128_v29, 0.0  ;;  %v1865_v56 = vmax.f32 %v1123_v53, 0.0  ;;  %v1879_v29 = vmax.f32 %v1193_v40, 0.0  ;;  %v1098_v53 = vadd.f32 %v4518_v2, %v4528_v14  ;;  %v4727_v10 = vpop.f32.mrf.mxu1 }
 0x267   :  { %v4680_v6 = vpop.f32.mrf.mxu0  ;;  %3237 = vmatpush3.msra.mxu1 %v1870_v20  ;;  %v1881_v20 = vmax.f32 %v1203_v55, 0.0  ;;  %5048 = vst [vmem:[#allocation26_spill] sm:$0xff] %v4727_v10 }
 0x268   :  { %3238 = vmatprep.subr.mxu1 %v1885_v0  ;;  %v4733_v17 = vpop.f32.mrf.mxu1 }
 0x269   :  { %v4685_v11 = vpop.f32.mrf.mxu0  ;;  %3239 = vmatpush3.msra.mxu1 %v1869_v42  ;;  %v1108_v42 = vadd.f32 %v4518_v2, %v4539_v62  ;;  %v1178_v62 = vadd.f32 %v4518_v2, %v4614_v9  ;;  %5049 = vst [vmem:[#allocation27_spill] sm:$0xff] %v4733_v17 }
 0x26a   :  { %3240 = vmatprep.subr.mxu1 %v1884_v16  ;;  %v4737_v3 = vpop.f32.mrf.mxu1 }
 0x26b   :  { %v4693_v13 = vpop.f32.mrf.mxu0  ;;  %3241 = vmatpush3.msra.mxu1 %v1868_v4  ;;  %v1103_v4 = vadd.f32 %v4518_v2, %v4546_v23  ;;  %v1173_v23 = vadd.f32 %v4518_v2, %v4618_v28  ;;  %v1876_v40 = vmax.f32 %v1178_v62, 0.0  ;;  %v1996_v28 = vld [vmem:[#allocation6 + $0x40] sm:$0xff]  ;;  %5050 = vst [vmem:[#allocation28_spill] sm:$0xff] %v4737_v3 }
 0x26c   :  { %3242 = vmatprep.subr.mxu1 %v1883_v5  ;;  %v1878_v5 = vmax.f32 %v1188_v12, 0.0  ;;  %v1859_v12 = vmax.f32 %v1093_v7, 0.0 }
 0x26d   :  { %v4699_v39 = vpop.f32.mrf.mxu0  ;;  %3243 = vmatpush3.msra.mxu1 %v1867_v50  ;;  %v1862_v50 = vmax.f32 %v1108_v42, 0.0  ;;  %v1999_v42 = vld [vmem:[#allocation6 + $0x58] sm:$0xff] }
 0x26e   :  { %3244 = vmatprep.subr.mxu1 %v1882_v61  ;;  %v1877_v61 = vmax.f32 %v1183_v15, 0.0 }
 0x26f   :  { %v4707_v0 = vpop.f32.mrf.mxu0  ;;  %3245 = vmatpush3.msra.mxu1 %v1866_v49  ;;  %v1861_v49 = vmax.f32 %v1103_v4, 0.0  ;;  %v4743_v4 = vpop.f32.mrf.mxu1 }
 0x270   :  { %3246 = vmatprep.subr.mxu1 %v1881_v20  ;;  %v1860_v20 = vmax.f32 %v1098_v53, 0.0  ;;  %5051 = vst [vmem:[#allocation29_spill] sm:$0xff] %v4743_v4 }
 0x271   :  { %v4713_v16 = vpop.f32.mrf.mxu0  ;;  %3247 = vmatpush3.msra.mxu1 %v1865_v56  ;;  %v1875_v56 = vmax.f32 %v1173_v23, 0.0 }
 0x272   :  { %3248 = vmatprep.subr.mxu1 %v1880_v35 }
 0x273   :  { %v4721_v55 = vpop.f32.mrf.mxu0  ;;  %3249 = vmatpush3.msra.mxu1 %v1864_v58 }
 0x274   :  { %3250 = vmatprep.subr.mxu1 %v1879_v29 }
 0x275   :  { %v3694_v52 = vpop.f32.mrf.mxu0  ;;  %3251 = vmatpush3.msra.mxu1 %v1863_v51 }
 0x276   :  { %3252 = vmatprep.subr.mxu1 %v1878_v5  ;;  %v4749_v5 = vpop.f32.mrf.mxu1 }
 0x277   :  { %v1312_v9 = vpop.f32.mrf.mxu0  ;;  %3253 = vmatpush3.msra.mxu1 %v1862_v50  ;;  %5052 = vst [vmem:[#allocation30_spill] sm:$0xff] %v4749_v5 }
 0x278   :  { %3254 = vmatprep.subr.mxu1 %v1877_v61  ;;  %v4753_v23 = vpop.f32.mrf.mxu1 }
 0x279   :  { %v3697_v14 = vpop.f32.mrf.mxu0  ;;  %3255 = vmatpush3.msra.mxu1 %v1861_v49  ;;  %5053 = vst [vmem:[#allocation31_spill] sm:$0xff] %v4753_v23  ;;  %v1318_v23 = vadd.f32 %v4518_v2, %v3694_v52  ;;  %v1308_v52 = vadd.f32 %v4518_v2, %v4713_v16  ;;  %v1298_v16 = vadd.f32 %v4518_v2, %v4699_v39 }
 0x27a   :  { %3256 = vmatprep.subr.mxu1 %v1876_v40  ;;  %v4757_v49 = vpop.f32.mrf.mxu1  ;;  %v1328_v46 = vadd.f32 %v4518_v2, %v3697_v14  ;;  %v1288_v39 = vadd.f32 %v4518_v2, %v4685_v11 }
 0x27b   :  { %v1322_v35 = vpop.f32.mrf.mxu0  ;;  %3257 = vmatpush3.msra.mxu1 %v1860_v20  ;;  %5054 = vst [vmem:[#allocation32_spill] sm:$0xff] %v4757_v49 }
 0x27c   :  { %3258 = vmatprep.subr.mxu1 %v1875_v56  ;;  %v4759_v56 = vpop.f32.mrf.mxu1  ;;  %v1323_v44 = vadd.f32 %v4518_v2, %v1322_v35  ;;  %v1906_v5 = vmax.f32 %v1328_v46, 0.0  ;;  %v1904_v46 = vmax.f32 %v1318_v23, 0.0  ;;  %v1902_v23 = vmax.f32 %v1308_v52, 0.0 }
 0x27d   :  { %v4735_v58 = vpop.f32.mrf.mxu0  ;;  %3259 = vmatpush3.msra.mxu1 %v1859_v12  ;;  %5055 = vst [vmem:[#allocation33_spill] sm:$0xff] %v4759_v56 }
 0x27e   :  { %2349 = vmatmul.mubr.f32.vlgmr.msra.gmra.mxu1 %v1996_v28 }
 0x27f   :  { %v4739_v15 = vpop.f32.mrf.mxu0  ;;  %2418 = vmatprep.mubr.f32.mxu1 %v1999_v42  ;;  %v4761_v42 = vpop.f32.mrf.mxu1 }
 0x280   :  { %5056 = vst [vmem:[#allocation34_spill] sm:$0xff] %v4761_v42 }
 0x281   :  { %v4741_v29 = vpop.f32.mrf.mxu0  ;;  %v4764_v34 = vpop.f32.mrf.mxu1 }
 0x282   :  { %5057 = vst [vmem:[#allocation35_spill] sm:$0xff] %v4764_v34  ;;  %v1313_v34 = vadd.f32 %v4518_v2, %v1312_v9 }
 0x283   :  { %v4745_v51 = vpop.f32.mrf.mxu0  ;;  %v4771_v56 = vpop.f32.mrf.mxu1 }
 0x284   :  { %v1903_v9 = vmax.f32 %v1313_v34, 0.0  ;;  %v1293_v34 = vadd.f32 %v4518_v2, %v4707_v0  ;;  %v1283_v0 = vadd.f32 %v4518_v2, %v4693_v13 }
 0x285   :  { %v4747_v62 = vpop.f32.mrf.mxu0 }
 0x286   :  { %v1358_v52 = vadd.f32 %v4518_v2, %v4747_v62  ;;  %v1897_v62 = vmax.f32 %v1283_v0, 0.0 }
 0x287   :  { %v4751_v53 = vpop.f32.mrf.mxu0 }
 0x289   :  { %v3709_v50 = vpop.f32.mrf.mxu0 }
 0x28b   :  { %v4755_v61 = vpop.f32.mrf.mxu0 }
 0x28d   :  { %v3712_v7 = vpop.f32.mrf.mxu0 }
 0x28f   :  { %v1372_v40 = vpop.f32.mrf.mxu0 }
 0x291   :  { %v3715_v20 = vpop.f32.mrf.mxu0 }
 0x292   :  { %v1388_v35 = vadd.f32 %v4518_v2, %v3715_v20  ;;  %v1373_v20 = vadd.f32 %v4518_v2, %v1372_v40  ;;  %v1363_v40 = vadd.f32 %v4518_v2, %v4755_v61 }
 0x293   :  { %v1382_v12 = vpop.f32.mrf.mxu0 }
 0x294   :  { %v1913_v13 = vmax.f32 %v1363_v40, 0.0 }
 0x295   :  { %v3718_v28 = vpop.f32.mrf.mxu0 }
 0x296   :  { %v1398_v10 = vadd.f32 %v4518_v2, %v3718_v28 }
 0x297   :  { %v1392_v26 = vpop.f32.mrf.mxu0 }
 0x298   :  { %v1393_v14 = vadd.f32 %v4518_v2, %v1392_v26  ;;  %v1920_v42 = vmax.f32 %v1398_v10, 0.0  ;;  %v1383_v26 = vadd.f32 %v4518_v2, %v1382_v12  ;;  %v1378_v10 = vadd.f32 %v4518_v2, %v3712_v7 }
 0x299   :  { %v3721_v63 = vpop.f32.mrf.mxu0  ;;  %v1368_v7 = vadd.f32 %v4518_v2, %v3709_v50  ;;  %v1899_v50 = vmax.f32 %v1293_v34, 0.0  ;;  %v1338_v34 = vadd.f32 %v4518_v2, %v4735_v58 }
 0x29a   :  { %v1408_v45 = vadd.f32 %v4518_v2, %v3721_v63  ;;  %v1905_v63 = vmax.f32 %v1323_v44, 0.0  ;;  %v1303_v44 = vadd.f32 %v4518_v2, %v4721_v55  ;;  %v1917_v12 = vmax.f32 %v1383_v26, 0.0 }
 0x29b   :  { %v1402_v17 = vpop.f32.mrf.mxu0  ;;  %v1916_v28 = vmax.f32 %v1378_v10, 0.0  ;;  %v1278_v26 = vadd.f32 %v4518_v2, %v4673_v38  ;;  %v1348_v10 = vadd.f32 %v4518_v2, %v4741_v29  ;;  %v1908_v40 = vmax.f32 %v1338_v34, 0.0 }
 0x29c   :  { %v1922_v4 = vmax.f32 %v1408_v45, 0.0  ;;  %v1403_v3 = vadd.f32 %v4518_v2, %v1402_v17  ;;  %v4780_v17 = vpop.f32.mrf.mxu1  ;;  %v1901_v55 = vmax.f32 %v1303_v44, 0.0  ;;  %v1353_v44 = vadd.f32 %v4518_v2, %v4751_v53 }
 0x29d   :  { %v4776_v45 = vpop.f32.mrf.mxu0 }
 0x29e   :  { %v1921_v49 = vmax.f32 %v1403_v3, 0.0  ;;  %3263 = vmatprep.subr.mxu1 %v1922_v4  ;;  %v1919_v3 = vmax.f32 %v1393_v14, 0.0  ;;  %v1918_v4 = vmax.f32 %v1388_v35, 0.0  ;;  %v1900_v14 = vmax.f32 %v1298_v16, 0.0 }
 0x29f   :  { %3264 = vmatpush3.msra.mxu1 %v1906_v5  ;;  %v4786_v5 = vpop.f32.mrf.mxu0  ;;  %v1915_v35 = vmax.f32 %v1373_v20, 0.0  ;;  %v1268_v16 = vadd.f32 %v4518_v2, %v4661_v19  ;;  %v1343_v20 = vadd.f32 %v4518_v2, %v4745_v51 }
 0x2a0   :  { %3265 = vmatprep.subr.mxu1 %v1921_v49  ;;  %v4790_v49 = vpop.f32.mrf.mxu1 }
 0x2a1   :  { %3266 = vmatpush3.msra.mxu1 %v1905_v63 }
 0x2a2   :  { %3267 = vmatprep.subr.mxu1 %v1920_v42  ;;  %v4796_v42 = vpop.f32.mrf.mxu0  ;;  %v4800_v63 = vpop.f32.mrf.mxu1 }
 0x2a3   :  { %3268 = vmatpush3.msra.mxu1 %v1904_v46  ;;  %v1914_v46 = vmax.f32 %v1368_v7, 0.0  ;;  %v1258_v7 = vadd.f32 %v4518_v2, %v4650_v8 }
 0x2a4   :  { %3269 = vmatprep.subr.mxu1 %v1919_v3  ;;  %v4808_v11 = vpop.f32.mrf.mxu0  ;;  %v1898_v3 = vmax.f32 %v1288_v39, 0.0  ;;  %v4812_v61 = vpop.f32.mrf.mxu1  ;;  %v1333_v39 = vadd.f32 %v4518_v2, %v4739_v15 }
 0x2a5   :  { %3270 = vmatpush3.msra.mxu1 %v1903_v9  ;;  %v1273_v9 = vadd.f32 %v4518_v2, %v4680_v6  ;;  %v1911_v6 = vmax.f32 %v1353_v44, 0.0  ;;  %v1892_v0 = vmax.f32 %v1258_v7, 0.0 }
 0x2a6   :  { %3271 = vmatprep.subr.mxu1 %v1918_v4  ;;  %v1912_v4 = vmax.f32 %v1358_v52, 0.0  ;;  %v4820_v38 = vpop.f32.mrf.mxu0  ;;  %v4824_v53 = vpop.f32.mrf.mxu1  ;;  %v1907_v15 = vmax.f32 %v1333_v39, 0.0 }
 0x2a7   :  { %3272 = vmatpush3.msra.mxu1 %v1902_v23  ;;  %v1896_v23 = vmax.f32 %v1278_v26, 0.0  ;;  %v1895_v29 = vmax.f32 %v1273_v9, 0.0  ;;  %v1483_v26 = vadd.f32 %v4518_v2, %v4521_v27  ;;  %v1478_v9 = vadd.f32 %v4518_v2, %v4509_v32 }
 0x2a8   :  { %3273 = vmatprep.subr.mxu1 %v1917_v12  ;;  %v1263_v12 = vadd.f32 %v4518_v2, %v4668_v43  ;;  %v4832_v19 = vpop.f32.mrf.mxu0  ;;  %v4836_v51 = vpop.f32.mrf.mxu1  ;;  %v1909_v43 = vmax.f32 %v1343_v20, 0.0  ;;  %v1468_v20 = vadd.f32 %v4518_v2, %v4499_v37 }
 0x2a9   :  { %3274 = vmatpush3.msra.mxu1 %v1901_v55  ;;  %v1910_v55 = vmax.f32 %v1348_v10, 0.0  ;;  %v1553_v10 = vadd.f32 %v4518_v2, %v4638_v59 }
 0x2aa   :  { %3275 = vmatprep.subr.mxu1 %v1916_v28  ;;  %v1894_v28 = vmax.f32 %v1268_v16, 0.0  ;;  %v1893_v58 = vmax.f32 %v1263_v12, 0.0  ;;  %v3733_v8 = vpop.f32.mrf.mxu0  ;;  %v4846_v52 = vpop.f32.mrf.mxu1  ;;  %v1548_v16 = vadd.f32 %v4518_v2, %v4628_v1  ;;  %v1543_v12 = vadd.f32 %v4518_v2, %v4632_v36 }
 0x2ab   :  { %3276 = vmatpush3.msra.mxu1 %v1900_v14  ;;  %v1253_v14 = vadd.f32 %v4518_v2, %v4656_v30  ;;  %v1533_v36 = vadd.f32 %v4518_v2, %v4622_v18  ;;  %v1523_v18 = vadd.f32 %v4518_v2, %v4612_v31  ;;  %v1513_v31 = vadd.f32 %v4518_v2, %v4594_v54 }
 0x2ac   :  { %3277 = vmatprep.subr.mxu1 %v1915_v35  ;;  %v1568_v35 = vadd.f32 %v4518_v2, %v4640_v21  ;;  %v1998_v21 = vld [vmem:[#allocation6 + $0x50] sm:$0xff]  ;;  %v1950_v37 = vmax.f32 %v1548_v16, 0.0 }
 0x2ad   :  { %3278 = vmatpush3.msra.mxu1 %v1899_v50  ;;  %v1488_v50 = vadd.f32 %v4518_v2, %v4513_v25  ;;  %v1891_v30 = vmax.f32 %v1253_v14, 0.0  ;;  %v1442_v25 = vpop.f32.mrf.mxu0 }
 0x2ae   :  { %3279 = vmatprep.subr.mxu1 %v1914_v46  ;;  %v1563_v46 = vadd.f32 %v4518_v2, %v4643_v33  ;;  %v1954_v44 = vmax.f32 %v1568_v35, 0.0  ;;  %v4856_v33 = vpop.f32.mrf.mxu1  ;;  %v1448_v35 = vadd.f32 %v4518_v2, %v3733_v8  ;;  %v1438_v8 = vadd.f32 %v4518_v2, %v4820_v38 }
 0x2af   :  { %3280 = vmatpush3.msra.mxu1 %v1898_v3  ;;  %v1558_v3 = vadd.f32 %v4518_v2, %v4636_v48  ;;  %v1473_v48 = vadd.f32 %v4518_v2, %v4511_v22  ;;  %v1951_v22 = vmax.f32 %v1553_v10, 0.0  ;;  %v1428_v38 = vadd.f32 %v4518_v2, %v4796_v42  ;;  %v5058_v10 = vld [vmem:[#allocation19_spill] sm:$0xff] }
 0x2b0   :  { %3281 = vmatprep.subr.mxu1 %v1913_v13  ;;  %v2001_v13 = vld [vmem:[#allocation6 + $0x68] sm:$0xff]  ;;  %v1953_v27 = vmax.f32 %v1563_v46, 0.0  ;;  %v4866_v59 = vpop.f32.mrf.mxu1  ;;  %v1503_v54 = vadd.f32 %v4518_v2, %v5058_v10  ;;  %v1418_v42 = vadd.f32 %v4518_v2, %v4776_v45  ;;  %v4916_v45 = vld [vmem:[%s5031_s3] ss:$0 sm:$0xff] }
 0x2b1   :  { %3282 = vmatpush3.msra.mxu1 %v1897_v62  ;;  %v1938_v62 = vmax.f32 %v1488_v50, 0.0  ;;  %v1952_v32 = vmax.f32 %v1558_v3, 0.0  ;;  %v1935_v34 = vmax.f32 %v1473_v48, 0.0  ;;  %v1947_v50 = vmax.f32 %v1533_v36, 0.0 }
 0x2b2   :  { %3283 = vmatprep.subr.mxu1 %v1912_v4  ;;  %v1937_v4 = vmax.f32 %v1483_v26, 0.0  ;;  %v4875_v39 = vpop.f32.mrf.mxu1  ;;  %v1930_v26 = vmax.f32 %v1448_v35, 0.0  ;;  %v1945_v3 = vmax.f32 %v1523_v18, 0.0 }
 0x2b3   :  { %3284 = vmatpush3.msra.mxu1 %v1896_v23  ;;  %v3736_v23 = vpop.f32.mrf.mxu0 }
 0x2b4   :  { %3285 = vmatprep.subr.mxu1 %v1911_v6  ;;  %v1936_v6 = vmax.f32 %v1478_v9, 0.0  ;;  %v1458_v1 = vadd.f32 %v4518_v2, %v3736_v23  ;;  %v1928_v9 = vmax.f32 %v1438_v8, 0.0  ;;  %v1708_v8 = vadd.f32 %v4916_v45, %v4875_v39 }
 0x2b5   :  { %3286 = vmatpush3.msra.mxu1 %v1895_v29  ;;  %v1463_v29 = vadd.f32 %v4518_v2, %v4505_v41  ;;  %v1452_v7 = vpop.f32.mrf.mxu0  ;;  %v1698_v39 = vadd.f32 %v4916_v45, %v4856_v33  ;;  %v1688_v33 = vadd.f32 %v4916_v45, %v4836_v51  ;;  %v1678_v51 = vadd.f32 %v4916_v45, %v4812_v61 }
 0x2b6   :  { %3287 = vmatprep.subr.mxu1 %v1910_v55  ;;  %v1538_v55 = vadd.f32 %v4518_v2, %v4616_v57  ;;  %v1932_v14 = vmax.f32 %v1458_v1, 0.0  ;;  %v1528_v57 = vadd.f32 %v4518_v2, %v4606_v47  ;;  %v5061_v1 = vld [vmem:[#allocation34_spill] sm:$0xff]  ;;  %v1668_v61 = vadd.f32 %v4916_v45, %v4790_v49 }
 0x2b7   :  { %3288 = vmatpush3.msra.mxu1 %v1894_v28  ;;  %v1934_v28 = vmax.f32 %v1468_v20, 0.0  ;;  %v1933_v41 = vmax.f32 %v1463_v29, 0.0  ;;  %v5060_v20 = vld [vmem:[#allocation18_spill] sm:$0xff]  ;;  %v1658_v49 = vadd.f32 %v4916_v45, %v4771_v56 }
 0x2b8   :  { %3289 = vmatprep.subr.mxu1 %v1909_v43  ;;  %v1949_v43 = vmax.f32 %v1543_v12, 0.0  ;;  %v1946_v47 = vmax.f32 %v1528_v57, 0.0  ;;  %v1941_v12 = vmax.f32 %v1503_v54, 0.0  ;;  %v2003_v57 = vld [vmem:[#allocation6 + $0x78] sm:$0xff] }
 0x2b9   :  { %3290 = vmatpush3.msra.mxu1 %v1893_v58  ;;  %v1453_v58 = vadd.f32 %v4518_v2, %v1452_v7 }
 0x2ba   :  { %3291 = vmatprep.subr.mxu1 %v1908_v40  ;;  %v1948_v40 = vmax.f32 %v1538_v55, 0.0  ;;  %v1648_v55 = vadd.f32 %v4916_v45, %v5061_v1 }
 0x2bb   :  { %3292 = vmatpush3.msra.mxu1 %v1892_v0  ;;  %v4883_v0 = vpop.f32.mrf.mxu1  ;;  %v1931_v46 = vmax.f32 %v1453_v58, 0.0 }
 0x2bc   :  { %3293 = vmatprep.subr.mxu1 %v1907_v15  ;;  %v1443_v15 = vadd.f32 %v4518_v2, %v1442_v25  ;;  %v1970_v18 = vmax.f32 %v1648_v55, 0.0  ;;  %v5072_v55 = vld [vmem:[#allocation25_spill] sm:$0xff] }
 0x2bd   :  { %3294 = vmatpush3.msra.mxu1 %v1891_v30  ;;  %v1518_v30 = vadd.f32 %v4518_v2, %v4580_v60  ;;  %v1508_v60 = vadd.f32 %v4518_v2, %v4553_v24 }
 0x2be   :  { %2419 = vmatmul.mubr.f32.vlgmr.msra.gmra.mxu1 %v1998_v21  ;;  %3298 = vmatprep.subr.mxu1 %v1954_v44  ;;  %v3814_v21 = vpop.f32.mrf.mxu1  ;;  %v1433_v44 = vadd.f32 %v4518_v2, %v4832_v19  ;;  %v1929_v25 = vmax.f32 %v1443_v15, 0.0  ;;  %v1423_v19 = vadd.f32 %v4518_v2, %v4808_v11  ;;  %v1413_v11 = vadd.f32 %v4518_v2, %v4786_v5 }
 0x2bf   :  { %3299 = vmatpush3.msra.mxu1 %v1938_v62  ;;  %2488 = vmatprep.mubr.f32.mxu1 %v2001_v13  ;;  %v1944_v13 = vmax.f32 %v1518_v30, 0.0  ;;  %v1942_v16 = vmax.f32 %v1508_v60, 0.0  ;;  %v1718_v58 = vadd.f32 %v4916_v45, %v3814_v21  ;;  %v5065_v21 = vld [vmem:[#allocation30_spill] sm:$0xff]  ;;  %v5066_v60 = vld [vmem:[#allocation31_spill] sm:$0xff] }
 0x2c0   :  { %3300 = vmatprep.subr.mxu1 %v1953_v27  ;;  %v1712_v62 = vpop.f32.mrf.mxu1  ;;  %v1943_v27 = vmax.f32 %v1513_v31, 0.0  ;;  %v1927_v48 = vmax.f32 %v1433_v44, 0.0  ;;  %v1925_v29 = vmax.f32 %v1423_v19, 0.0  ;;  %v1628_v31 = vadd.f32 %v4916_v45, %v5065_v21  ;;  %v5068_v19 = vld [vmem:[#allocation29_spill] sm:$0xff]  ;;  %v2002_v21 = vld [vmem:[#allocation6 + $0x70] sm:$0xff] }
 0x2c1   :  { %3301 = vmatpush3.msra.mxu1 %v1937_v4  ;;  %v5059_v4 = vld [vmem:[#allocation17_spill] sm:$0xff]  ;;  %v1703_v44 = vadd.f32 %v4916_v45, %v4883_v0  ;;  %v1693_v0 = vadd.f32 %v4916_v45, %v4866_v59  ;;  %v1683_v59 = vadd.f32 %v4916_v45, %v4846_v52  ;;  %v1673_v52 = vadd.f32 %v4916_v45, %v4824_v53 }
 0x2c2   :  { %3302 = vmatprep.subr.mxu1 %v1952_v32  ;;  %v1498_v24 = vadd.f32 %v4518_v2, %v5059_v4  ;;  %v1926_v32 = vmax.f32 %v1428_v38, 0.0  ;;  %v3817_v23 = vpop.f32.mrf.mxu1  ;;  %v1966_v54 = vmax.f32 %v1628_v31, 0.0  ;;  %v1663_v53 = vadd.f32 %v4916_v45, %v4800_v63 }
 0x2c3   :  { %3303 = vmatpush3.msra.mxu1 %v1936_v6  ;;  %v1493_v6 = vadd.f32 %v4518_v2, %v5060_v20  ;;  %v5070_v20 = vld [vmem:[#allocation27_spill] sm:$0xff]  ;;  %v1977_v1 = vmax.f32 %v1683_v59, 0.0  ;;  %v1653_v63 = vadd.f32 %v4916_v45, %v4780_v17  ;;  %v4069_v31 = vmov 0.0  }
 0x2c4   :  { %3304 = vmatprep.subr.mxu1 %v1951_v22  ;;  %v1728_v22 = vadd.f32 %v4518_v2, %v3817_v23  ;;  %v1722_v7 = vpop.f32.mrf.mxu1  ;;  %v5062_v2 = vld [vmem:[#allocation35_spill] sm:$0xff]  ;;  %v1979_v23 = vmax.f32 %v1693_v0, 0.0  ;;  %v2572_v0 = vld [vmem:[#allocation9 + $0x10] sm:$0xff] }
 0x2c5   :  { %3305 = vmatpush3.msra.mxu1 %v1935_v34  ;;  %v1940_v34 = vmax.f32 %v1498_v24, 0.0  ;;  %v1643_v5 = vadd.f32 %v4916_v45, %v5062_v2  ;;  %v1980_v24 = vmax.f32 %v1698_v39, 0.0  ;;  %v2585_v17 = vld [vmem:[#allocation9 + $0x78] sm:$0xff] }
 0x2c6   :  { %3306 = vmatprep.subr.mxu1 %v1950_v37  ;;  %v1924_v37 = vmax.f32 %v1418_v42, 0.0  ;;  %v1986_v36 = vmax.f32 %v1728_v22, 0.0  ;;  %v1978_v22 = vmax.f32 %v1688_v33, 0.0  ;;  %v2577_v39 = vld [vmem:[#allocation9 + $0x38] sm:$0xff] }
 0x2c7   :  { %3307 = vmatpush3.msra.mxu1 %v1934_v28  ;;  %v1939_v28 = vmax.f32 %v1493_v6, 0.0  ;;  %v1603_v6 = vadd.f32 %v4916_v45, %v5070_v20 }
 0x2c8   :  { %3308 = vmatprep.subr.mxu1 %v1949_v43  ;;  %v1723_v43 = vadd.f32 %v4916_v45, %v1722_v7 }
 0x2c9   :  { %3309 = vmatpush3.msra.mxu1 %v1933_v41  ;;  %v1923_v41 = vmax.f32 %v1413_v11, 0.0  ;;  %v5071_v11 = vld [vmem:[#allocation24_spill] sm:$0xff]  ;;  %v1961_v7 = vmax.f32 %v1603_v6, 0.0 }
 0x2ca   :  { %3310 = vmatprep.subr.mxu1 %v1948_v40  ;;  %v5063_v40 = vld [vmem:[#allocation32_spill] sm:$0xff]  ;;  %v1985_v15 = vmax.f32 %v1723_v43, 0.0 }
 0x2cb   :  { %3311 = vmatpush3.msra.mxu1 %v1932_v14  ;;  %v2000_v14 = vld [vmem:[#allocation6 + $0x60] sm:$0xff]  ;;  %v1638_v35 = vadd.f32 %v4916_v45, %v5063_v40 }
 0x2cc   :  { %3312 = vmatprep.subr.mxu1 %v1947_v50  ;;  %v1713_v50 = vadd.f32 %v4916_v45, %v1712_v62  ;;  %v5067_v62 = vld [vmem:[#allocation28_spill] sm:$0xff] }
 0x2cd   :  { %3313 = vmatpush3.msra.mxu1 %v1931_v46  ;;  %v5064_v46 = vld [vmem:[#allocation33_spill] sm:$0xff]  ;;  %v1618_v10 = vadd.f32 %v4916_v45, %v5067_v62  ;;  %v5075_v40 = vld [vmem:[#allocation20_spill] sm:$0xff] }
 0x2ce   :  { %3314 = vmatprep.subr.mxu1 %v1946_v47  ;;  %v1633_v30 = vadd.f32 %v4916_v45, %v5064_v46  ;;  %v1969_v47 = vmax.f32 %v1643_v5, 0.0  ;;  %v1975_v5 = vmax.f32 %v1673_v52, 0.0  ;;  %v2575_v62 = vld [vmem:[#allocation9 + $0x28] sm:$0xff] }
 0x2cf   :  { %3315 = vmatpush3.msra.mxu1 %v1930_v26  ;;  %v1984_v26 = vmax.f32 %v1718_v58, 0.0 }
 0x2d0   :  { %3316 = vmatprep.subr.mxu1 %v1945_v3  ;;  %v1968_v3 = vmax.f32 %v1638_v35, 0.0  ;;  %v1967_v38 = vmax.f32 %v1633_v30, 0.0  ;;  %v1578_v35 = vadd.f32 %v4916_v45, %v5075_v40  ;;  %v2712_v40 = vld [vmem:[#allocation11 + $0x60] sm:$0xff] }
 0x2d1   :  { %3317 = vmatpush3.msra.mxu1 %v1929_v25  ;;  %v1983_v25 = vmax.f32 %v1713_v50, 0.0  ;;  %v1973_v50 = vmax.f32 %v1663_v53, 0.0 }
 0x2d2   :  { %3318 = vmatprep.subr.mxu1 %v1944_v13  ;;  %v1623_v13 = vadd.f32 %v4916_v45, %v5066_v60  ;;  %v1956_v56 = vmax.f32 %v1578_v35, 0.0  ;;  %v2580_v60 = vld [vmem:[#allocation9 + $0x50] sm:$0xff]  ;;  %v2711_v35 = vld [vmem:[#allocation11 + $0x58] sm:$0xff] }
 0x2d3   :  { %3319 = vmatpush3.msra.mxu1 %v1928_v9  ;;  %v1982_v9 = vmax.f32 %v1708_v8, 0.0  ;;  %v1971_v8 = vmax.f32 %v1653_v63, 0.0  ;;  %v2709_v63 = vld [vmem:[#allocation11 + $0x48] sm:$0xff] }
 0x2d4   :  { %3320 = vmatprep.subr.mxu1 %v1943_v27  ;;  %v1981_v27 = vmax.f32 %v1703_v44, 0.0  ;;  %v1965_v4 = vmax.f32 %v1623_v13, 0.0  ;;  %v2582_v44 = vld [vmem:[#allocation9 + $0x60] sm:$0xff]  ;;  %v2579_v13 = vld [vmem:[#allocation9 + $0x48] sm:$0xff] }
 0x2d5   :  { %3321 = vmatpush3.msra.mxu1 %v1927_v48  ;;  %v1613_v48 = vadd.f32 %v4916_v45, %v5068_v19  ;;  %v2570_v19 = vld [vmem:[#allocation9] sm:$0xff] }
 0x2d6   :  { %3322 = vmatprep.subr.mxu1 %v1942_v16  ;;  %v5069_v16 = vld [vmem:[#allocation26_spill] sm:$0xff] }
 0x2d7   :  { %3323 = vmatpush3.msra.mxu1 %v1926_v32  ;;  %v1608_v42 = vadd.f32 %v4916_v45, %v5069_v16  ;;  %v1964_v32 = vmax.f32 %v1618_v10, 0.0  ;;  %v2574_v10 = vld [vmem:[#allocation9 + $0x20] sm:$0xff] }
 0x2d8   :  { %3324 = vmatprep.subr.mxu1 %v1941_v12  ;;  %v1963_v12 = vmax.f32 %v1613_v48, 0.0  ;;  %v3120_v48 = vpop.f32.mrf.mxu1 }
 0x2d9   :  { %3325 = vmatpush3.msra.mxu1 %v1925_v29  ;;  %v1598_v29 = vadd.f32 %v4916_v45, %v5071_v11 }
 0x2da   :  { %3326 = vmatprep.subr.mxu1 %v1940_v34  ;;  %v1962_v34 = vmax.f32 %v1608_v42, 0.0 }
 0x2db   :  { %3327 = vmatpush3.msra.mxu1 %v1924_v37  ;;  %v1593_v37 = vadd.f32 %v4916_v45, %v5072_v55  ;;  %v1960_v2 = vmax.f32 %v1598_v29, 0.0 }
 0x2dc   :  { %3328 = vmatprep.subr.mxu1 %v1939_v28  ;;  %v1976_v28 = vmax.f32 %v1678_v51, 0.0 }
 0x2dd   :  { %3329 = vmatpush3.msra.mxu1 %v1923_v41  ;;  %v5074_v41 = vld [vmem:[#allocation23_spill] sm:$0xff]  ;;  %v1959_v58 = vmax.f32 %v1593_v37, 0.0 }
 0x2de   :  { %2489 = vmatmul.mubr.f32.vlgmr.msra.gmra.mxu1 %v2000_v14  ;;  %3333 = vmatprep.subr.mxu1 %v1986_v36  ;;  %v5073_v36 = vld [vmem:[#allocation22_spill] sm:$0xff]  ;;  %v1583_v14 = vadd.f32 %v4916_v45, %v5074_v41 }
 0x2df   :  { %3334 = vmatpush3.msra.mxu1 %v1970_v18  ;;  %2558 = vmatprep.mubr.f32.mxu1 %v2003_v57  ;;  %v1588_v43 = vadd.f32 %v4916_v45, %v5073_v36  ;;  %v1974_v57 = vmax.f32 %v1668_v61, 0.0 }
 0x2e0   :  { %3335 = vmatprep.subr.mxu1 %v1985_v15  ;;  %v5076_v15 = vld [vmem:[#allocation21_spill] sm:$0xff]  ;;  %v1957_v30 = vmax.f32 %v1583_v14, 0.0 }
 0x2e1   :  { %3336 = vmatpush3.msra.mxu1 %v1969_v47  ;;  %v1958_v18 = vmax.f32 %v1588_v43, 0.0  ;;  %v1573_v46 = vadd.f32 %v4916_v45, %v5076_v15  ;;  %v1972_v47 = vmax.f32 %v1658_v49, 0.0  ;;  %v2583_v45 = vld [vmem:[#allocation9 + $0x68] sm:$0xff]  ;;  %v2714_v49 = vld [vmem:[#allocation11 + $0x70] sm:$0xff]  ;;  %v2707_v15 = vld [vmem:[#allocation11 + $0x38] sm:$0xff] }
 0x2e2   :  { %3337 = vmatprep.subr.mxu1 %v1984_v26 }
 0x2e3   :  { %3338 = vmatpush3.msra.mxu1 %v1968_v3  ;;  %v1955_v26 = vmax.f32 %v1573_v46, 0.0  ;;  %v2584_v3 = vld [vmem:[#allocation9 + $0x70] sm:$0xff] }
 0x2e4   :  { %3339 = vmatprep.subr.mxu1 %v1983_v25  ;;  %v2581_v25 = vld [vmem:[#allocation9 + $0x58] sm:$0xff]  ;;  %v2706_v46 = vld [vmem:[#allocation11 + $0x30] sm:$0xff] }
 0x2e5   :  { %3340 = vmatpush3.msra.mxu1 %v1967_v38  ;;  %v2578_v38 = vld [vmem:[#allocation9 + $0x40] sm:$0xff] }
 0x2e6   :  { %3341 = vmatprep.subr.mxu1 %v1982_v9  ;;  %v2576_v9 = vld [vmem:[#allocation9 + $0x30] sm:$0xff] }
 0x2e7   :  { %3342 = vmatpush3.msra.mxu1 %v1966_v54  ;;  %v2573_v54 = vld [vmem:[#allocation9 + $0x18] sm:$0xff] }
 0x2e8   :  { %3343 = vmatprep.subr.mxu1 %v1981_v27  ;;  %v2571_v27 = vld [vmem:[#allocation9 + $0x8] sm:$0xff] }
 0x2e9   :  { %3344 = vmatpush3.msra.mxu1 %v1965_v4  ;;  %v3121_v4 = vpop.f32.mrf.mxu1 }
 0x2ea   :  { %3345 = vmatprep.subr.mxu1 %v1980_v24 }
 0x2eb   :  { %3346 = vmatpush3.msra.mxu1 %v1964_v32  ;;  %v3155_v33 = vpop.f32.mrf.mxu1 }
 0x2ec   :  { %3347 = vmatprep.subr.mxu1 %v1979_v23 }
 0x2ed   :  { %3348 = vmatpush3.msra.mxu1 %v1963_v12  ;;  %v3156_v24 = vpop.f32.mrf.mxu1  ;;  %v3122_v12 = vadd.f32 %v3121_v4, %v3120_v48 }
 0x2ee   :  { %3349 = vmatprep.subr.mxu1 %v1978_v22  ;;  %v3157_v51 = vadd.f32 %v3156_v24, %v3155_v33 }
 0x2ef   :  { %3350 = vmatpush3.msra.mxu1 %v1962_v34  ;;  %v3190_v16 = vpop.f32.mrf.mxu1 }
 0x2f0   :  { %3351 = vmatprep.subr.mxu1 %v1977_v1  ;;  %v2141_v11 = vadd.f32 %v3157_v51, %v3122_v12  ;;  %v2815_v12 = vld [vmem:[%s5037_s9] ss:$0 sm:$0xff] }
 0x2f1   :  { %3352 = vmatpush3.msra.mxu1 %v1961_v7  ;;  %v3191_v42 = vpop.f32.mrf.mxu1 }
 0x2f2   :  { %3353 = vmatprep.subr.mxu1 %v1976_v28  ;;  %v3192_v29 = vadd.f32 %v3191_v42, %v3190_v16  ;;  %v2813_v42 = vld [vmem:[%s5034_s6] ss:$0 sm:$0xff]  ;;  %s4034_s6 = scalar_lea.vmem %s2801_s27, 128 }
 0x2f3   :  { %3354 = vmatpush3.msra.mxu1 %v1960_v2  ;;  %p4035_p11 = scmp.ne.s32.totalorder %s2801_s27, %s4034_s6  ;;  %p4040_p13 = scmp.lt.s32.totalorder %s4034_s6, %s4034_s6 }
 0x2f4   :  { %3355 = vmatprep.subr.mxu1 %v1975_v5  ;;  %v2211_v1 = vadd.f32 %v3192_v29, %v2141_v11 }
 0x2f5   :  { %3356 = vmatpush3.msra.mxu1 %v1959_v58  ;;  %v2715_v58 = vld [vmem:[#allocation11 + $0x78] sm:$0xff]  ;;  %p4041_p0 = por %p4040_p13, %p4039_p12 }
 0x2f6   :  { %3357 = vmatprep.subr.mxu1 %v1974_v57  ;;  %v2713_v57 = vld [vmem:[#allocation11 + $0x68] sm:$0xff] }
 0x2f7   :  { %3358 = vmatpush3.msra.mxu1 %v1958_v18  ;;  %v2710_v18 = vld [vmem:[#allocation11 + $0x50] sm:$0xff]  ;;  %p4042_p1 = pnand %p4041_p0, %p4035_p11 }
 0x2f8   :  { %3359 = vmatprep.subr.mxu1 %v1973_v50  ;;  %v2708_v50 = vld [vmem:[#allocation11 + $0x40] sm:$0xff] }
 0x2f9   :  { %3360 = vmatpush3.msra.mxu1 %v1957_v30  ;;  %v2705_v30 = vld [vmem:[#allocation11 + $0x28] sm:$0xff] }
 0x2fa   :  { %3361 = vmatprep.subr.mxu1 %v1972_v47  ;;  %v2704_v47 = vld [vmem:[#allocation11 + $0x20] sm:$0xff] }
 0x2fb   :  { %3362 = vmatpush3.msra.mxu1 %v1956_v56  ;;  %v2703_v56 = vld [vmem:[#allocation11 + $0x18] sm:$0xff] }
 0x2fc   :  { %3363 = vmatprep.subr.mxu1 %v1971_v8  ;;  %v2702_v8 = vld [vmem:[#allocation11 + $0x10] sm:$0xff] }
 0x2fd   :  { %3364 = vmatpush3.msra.mxu1 %v1955_v26  ;;  %v2701_v26 = vld [vmem:[#allocation11 + $0x8] sm:$0xff] }
 0x2fe   :  { %2559 = vmatmul.mubr.f32.vlgmr.msra.gmra.mxu1 %v2002_v21  ;;  %3818 = vmatprep.subr.mxu1 %v4069_v31  ;;  %v3225_v32 = vpop.f32.mrf.mxu1  ;;  %v2700_v21 = vld [vmem:[#allocation11] sm:$0xff] }
 0x2ff   :  { %3819 = vmatpush3.msra.mxu1 %v2585_v17  ;;  %3850 = vmatprep.mubr.msk.f32.mxu1 %vm4070_vm0, %v4069_v31  ;;  %v2812_v17 = vld [vmem:[%s5033_s5] ss:$0 sm:$0xff] }
 0x300   :  { %3820 = vmatprep.subr.mxu1 %v4069_v31  ;;  %v3226_v59 = vpop.f32.mrf.mxu1 }
 0x301   :  { %3821 = vmatpush3.msra.mxu1 %v2584_v3  ;;  %v3227_v52 = vadd.f32 %v3226_v59, %v3225_v32  ;;  %v2814_v59 = vld [vmem:[%s5035_s7] ss:$0 sm:$0xff] }
 0x302   :  { %3822 = vmatprep.subr.mxu1 %v4069_v31 }
 0x303   :  { %3823 = vmatpush3.msra.mxu1 %v2583_v45  ;;  %v2281_v7 = vadd.f32 %v3227_v52, %v2211_v1 }
 0x304   :  { %3824 = vmatprep.subr.mxu1 %v4069_v31 }
 0x305   :  { %3825 = vmatpush3.msra.mxu1 %v2582_v44 }
 0x306   :  { %3826 = vmatprep.subr.mxu1 %v4069_v31 }
 0x307   :  { %3827 = vmatpush3.msra.mxu1 %v2581_v25 }
 0x308   :  { %3828 = vmatprep.subr.mxu1 %v4069_v31 }
 0x309   :  { %3829 = vmatpush3.msra.mxu1 %v2580_v60 }
 0x30a   :  { %3830 = vmatprep.subr.mxu1 %v4069_v31 }
 0x30b   :  { %3831 = vmatpush3.msra.mxu1 %v2579_v13 }
 0x30c   :  { %3832 = vmatprep.subr.mxu1 %v4069_v31 }
 0x30d   :  { %3833 = vmatpush3.msra.mxu1 %v2578_v38 }
 0x30e   :  { %3834 = vmatprep.subr.mxu1 %v4069_v31 }
 0x30f   :  { %3835 = vmatpush3.msra.mxu1 %v2577_v39 }
 0x310   :  { %3836 = vmatprep.subr.mxu1 %v4069_v31 }
 0x311   :  { %3837 = vmatpush3.msra.mxu1 %v2576_v9 }
 0x312   :  { %3838 = vmatprep.subr.mxu1 %v4069_v31 }
 0x313   :  { %3839 = vmatpush3.msra.mxu1 %v2575_v62 }
 0x314   :  { %3840 = vmatprep.subr.mxu1 %v4069_v31 }
 0x315   :  { %3841 = vmatpush3.msra.mxu1 %v2574_v10 }
 0x316   :  { %3842 = vmatprep.subr.mxu1 %v4069_v31 }
 0x317   :  { %3843 = vmatpush3.msra.mxu1 %v2573_v54 }
 0x318   :  { %3844 = vmatprep.subr.mxu1 %v4069_v31 }
 0x319   :  { %3845 = vmatpush3.msra.mxu1 %v2572_v0 }
 0x31a   :  { %3846 = vmatprep.subr.mxu1 %v4069_v31 }
 0x31b   :  { %3847 = vmatpush3.msra.mxu1 %v2571_v27 }
 0x31c   :  { %3848 = vmatprep.subr.mxu1 %v4069_v31 }
 0x31d   :  { %3849 = vmatpush3.msra.mxu1 %v2570_v19 }
 0x31e   :  { %3853 = vmatprep.subr.mxu1 %v4069_v31 }
 0x33e   :  { %v3260_v23 = vpop.f32.mrf.mxu1 }
 0x340   :  { %v3261_v20 = vpop.f32.mrf.mxu1 }
 0x341   :  { %v3262_v55 = vadd.f32 %v3261_v20, %v3260_v23 }
 0x343   :  { %v2351_v28 = vadd.f32 %v3262_v55, %v2281_v7 }
 0x37e   :  { %v3295_v6 = vpop.f32.mrf.mxu1 }
 0x380   :  { %v3296_v22 = vpop.f32.mrf.mxu1 }
 0x381   :  { %v3297_v61 = vadd.f32 %v3296_v22, %v3295_v6 }
 0x383   :  { %v2421_v2 = vadd.f32 %v3297_v61, %v2351_v28 }
 0x39e   :  { %v3330_v34 = vpop.f32.mrf.mxu1 }
 0x3a0   :  { %v3331_v37 = vpop.f32.mrf.mxu1 }
 0x3a1   :  { %v3332_v36 = vadd.f32 %v3331_v37, %v3330_v34 }
 0x3a3   :  { %v2491_v5 = vadd.f32 %v3332_v36, %v2421_v2 }
 0x3be   :  { %v3365_v43 = vpop.f32.mrf.mxu1 }
 0x3c0   :  { %v3366_v53 = vpop.f32.mrf.mxu1 }
 0x3c1   :  { %v3367_v41 = vadd.f32 %v3366_v53, %v3365_v43 }
 0x3c3   :  { %v2561_v14 = vadd.f32 %v3367_v41, %v2491_v5 }
 0x3c5   :  { %3851 = vmatmul.mubr.f32.vlgmr.msra.gmra.mxu1 %v2561_v14 }
 0x3c6   :  { %3885 = vmatprep.mubr.msk.f32.mxu1 %vm4070_vm0, %v4069_v31  ;;  %3854 = vmatpush3.msra.mxu1 %v2715_v58 }
 0x3c7   :  { %3855 = vmatprep.subr.mxu1 %v4069_v31 }
 0x3c8   :  { %3856 = vmatpush3.msra.mxu1 %v2714_v49 }
 0x3c9   :  { %3857 = vmatprep.subr.mxu1 %v4069_v31 }
 0x3ca   :  { %3858 = vmatpush3.msra.mxu1 %v2713_v57 }
 0x3cb   :  { %3859 = vmatprep.subr.mxu1 %v4069_v31 }
 0x3cc   :  { %3860 = vmatpush3.msra.mxu1 %v2712_v40 }
 0x3cd   :  { %3861 = vmatprep.subr.mxu1 %v4069_v31 }
 0x3ce   :  { %3862 = vmatpush3.msra.mxu1 %v2711_v35 }
 0x3cf   :  { %3863 = vmatprep.subr.mxu1 %v4069_v31 }
 0x3d0   :  { %3864 = vmatpush3.msra.mxu1 %v2710_v18 }
 0x3d1   :  { %3865 = vmatprep.subr.mxu1 %v4069_v31 }
 0x3d2   :  { %3866 = vmatpush3.msra.mxu1 %v2709_v63 }
 0x3d3   :  { %3867 = vmatprep.subr.mxu1 %v4069_v31 }
 0x3d4   :  { %3868 = vmatpush3.msra.mxu1 %v2708_v50 }
 0x3d5   :  { %3869 = vmatprep.subr.mxu1 %v4069_v31 }
 0x3d6   :  { %3870 = vmatpush3.msra.mxu1 %v2707_v15 }
 0x3d7   :  { %3871 = vmatprep.subr.mxu1 %v4069_v31 }
 0x3d8   :  { %3872 = vmatpush3.msra.mxu1 %v2706_v46 }
 0x3d9   :  { %3873 = vmatprep.subr.mxu1 %v4069_v31 }
 0x3da   :  { %3874 = vmatpush3.msra.mxu1 %v2705_v30 }
 0x3db   :  { %3875 = vmatprep.subr.mxu1 %v4069_v31 }
 0x3dc   :  { %3876 = vmatpush3.msra.mxu1 %v2704_v47 }
 0x3dd   :  { %3877 = vmatprep.subr.mxu1 %v4069_v31 }
 0x3de   :  { %3878 = vmatpush3.msra.mxu1 %v2703_v56 }
 0x3df   :  { %3879 = vmatprep.subr.mxu1 %v4069_v31 }
 0x3e0   :  { %3880 = vmatpush3.msra.mxu1 %v2702_v8 }
 0x3e1   :  { %3881 = vmatprep.subr.mxu1 %v4069_v31 }
 0x3e2   :  { %3882 = vmatpush3.msra.mxu1 %v2701_v26 }
 0x3e3   :  { %3883 = vmatprep.subr.mxu1 %v4069_v31 }
 0x3e4   :  { %3884 = vmatpush3.msra.mxu1 %v2700_v21 }
 0x485   :  { %v2659_v3 = vpop.f32.mrf.mxu1 }
 0x486   :  { %v2660_v45 = vadd.f32 %v2812_v17, %v2659_v3 }
 0x487   :  { %v3852_v44 = vpop.f32.mrf.mxu1 }
 0x488   :  { %v2663_v25 = vrot.slane %v2660_v45, 4 }
 0x48a   :  { %v2664_v60 = vadd.f32 %v2663_v25, %v2660_v45 }
 0x48c   :  { %v2665_v13 = vrot.slane %v2664_v60, 2 }
 0x48e   :  { %v2666_v38 = vadd.f32 %v2665_v13, %v2664_v60 }
 0x490   :  { %v2667_v39 = vrot.slane %v2666_v38, 1 }
 0x492   :  { %v2668_v9 = vadd.f32 %v2667_v39, %v2666_v38 }
 0x494   :  { %v2670_v62 = vmul.f32 0.125, %v2668_v9 }
 0x496   :  { %v2671_v10 = vsub.f32 %v2660_v45, %v2670_v62 }
 0x498   :  { %v2672_v54 = vmul.f32 %v2671_v10, %v2671_v10 }
 0x49a   :  { %v2673_v0 = vrot.slane %v2672_v54, 4 }
 0x49c   :  { %v2674_v27 = vadd.f32 %v2673_v0, %v2672_v54 }
 0x49e   :  { %v2675_v31 = vrot.slane %v2674_v27, 2 }
 0x4a0   :  { %v2676_v19 = vadd.f32 %v2675_v31, %v2674_v27 }
 0x4a2   :  { %v2677_v48 = vrot.slane %v2676_v19, 1 }
 0x4a4   :  { %v2678_v4 = vadd.f32 %v2677_v48, %v2676_v19 }
 0x4a6   :  { %v2679_v33 = vmul.f32 0.125, %v2678_v4 }
 0x4a8   :  { %v2680_v24 = vadd.f32 1e-05, %v2679_v33 }
 0x4aa   :  { %3930 = vrsqrt.f32 %v2680_v24 }
 0x4b7   :  { %v3931_v16 = vpop.eup %3930 }
 0x4b8   :  { %v2682_v32 = vmul.f32 %v3931_v16, %v2671_v10 }
 0x4ba   :  { %v2690_v23 = vmul.f32 %v2813_v42, %v2682_v32 }
 0x4bc   :  { %v2698_v20 = vadd.f32 %v2814_v59, %v2690_v23 }
 0x4be   :  { %v2699_v6 = vmax.f32 %v2698_v20, 0.0 }
 0x4c0   :  { %3886 = vmatmul.mubr.f32.vlgmr.msra.gmra.mxu1 %v2699_v6 }
 0x580   :  { %v2789_v51 = vpop.f32.mrf.mxu1 }
 0x581   :  { %v2790_v22 = vadd.f32 %v2815_v12, %v2789_v51 }
 0x582   :  { %v3887_v11 = vpop.f32.mrf.mxu1 }
 0x583   :  { %2793 = vst [vmem:[#allocation12] sm:$0xff] %v2790_v22 }
 0x584   :  { %4045 = shalt.err (!%p4042_p1)
}
 0x585   :  { %2803 = dma.vmem_to_hbm [thread:$0]  %s2801_s27, 128, %s5038_s10, [#allocation5]  }
 0x586   :  { %4060 = dma.done.wait [#allocation5], 128  }
 0x587   :  { %4061 = vsyncadd [#allocation5], 4294967168 }
 0x588   :  { %2807 = vsyncpa [#allocation4], 1 }
 0x589   :  { %2808 = vsyncpa [#allocation7], 1 }
 0x58a   :  { %2809 = vsyncpa [#allocation10], 1 }
 0x58b   :  { %2810 = vsyncpa [#allocation5], 1 }

</bundles_post_ra>
